<compile_context>
chip_gen: v6e
topology: v6e:2x2x1
jax: 0.10.0
libtpu: 0.0.40
codegen_flags: <defaults>
</compile_context>

<pallas_src>
import math

import jax
import jax.numpy as jnp
from jax.experimental import pallas as pl
from jax.experimental.pallas import tpu as pltpu

# ----------------------------- model dimensions ------------------------------
B = 2                  # batch
GNN_DIM = 16           # args.gnn_output_dim (pooled_node_emb feature dim)
T_DIM = 16             # feature dim of T fed to the hyper net
META_DIM = GNN_DIM + T_DIM        # hyper_input_dim
HYPER_HID = 32         # hyper_hidden_dim
Z_DIM = 32             # z_dim
STATE_EMB = 8          # args.state_emb_dim
DEFENDER_NUM = 2
NODE_NUM = 10
MAX_T = 12             # args.max_time_horizon_for_state_emb
ACTION_DIM = NODE_NUM + 1         # action_dim (move to one of the nodes)
DYN_HID = 32           # dynamic_hidden_dim
USE_AUG = True         # args.use_augmentation
# policy_input_dim: node embs (defender_num+1) + time emb + agent emb (+ pooled)
POL_IN = STATE_EMB * (DEFENDER_NUM + 3) + (GNN_DIM if USE_AUG else 0)   # 56


def _vmem_specs(n):
    return [pl.BlockSpec(memory_space=pltpu.MemorySpace.VMEM)] * n


# --------------------------- fused actor kernel ------------------------------
def _row_matvec(wflat, act, out_dim, in_dim):
    """h[b, o] = sum_i wflat[b, o*in_dim + i] * act[b, i].

    Per-sample mat-vec (== torch.bmm with a length-1 rhs) done as VPU
    broadcast-multiply + cross-lane reduce on the flat generated weights.
    Avoids both the degenerate 1-row batched MXU matmuls and any in-kernel
    (B, out*in) -> (B, out, in) reshape.  All slices/loops are static.
    """
    cols = []
    for o in range(out_dim):
        seg = wflat[:, o * in_dim:(o + 1) * in_dim]            # (B, in_dim)
        cols.append(jnp.sum(seg * act, axis=1, keepdims=True))  # (B, 1)
    return jnp.concatenate(cols, axis=1)                        # (B, out_dim)


def _actor_fused_kernel(meta_ref, state_ref,
                        wh1_ref, bh1_ref, wh2_ref, bh2_ref,
                        w1w_ref, w1b_ref, b1w_ref, b1b_ref,
                        w2w_ref, w2b_ref, b2w_ref, b2b_ref,
                        w3w_ref, w3b_ref, b3w_ref, b3b_ref,
                        out_ref):
    f32 = jnp.float32

    # ---- Meta_Embadding (hyper MLP): meta_v -> z --------------------------------
    meta = meta_ref[...]                                                    # (B, META)
    h = jnp.maximum(
        jnp.dot(meta, wh1_ref[...], preferred_element_type=f32) + bh1_ref[...], 0.0)
    z = jnp.dot(h, wh2_ref[...], preferred_element_type=f32) + bh2_ref[...]  # (B, Z)
    zb = z.astype(jnp.bfloat16)   # bf16 MXU path for the big head matmuls

    # ---- Heads: per-sample weights/biases, flat in torch's .view layout ---------
    # All of these stay in VMEM / vregs; nothing is written back to HBM.
    w1f = jnp.dot(zb, w1w_ref[...], preferred_element_type=f32) + w1b_ref[...]  # (B, DH*POL_IN)
    b1 = jnp.dot(zb, b1w_ref[...], preferred_element_type=f32) + b1b_ref[...]   # (B, DH)
    w2f = jnp.dot(zb, w2w_ref[...], preferred_element_type=f32) + w2b_ref[...]  # (B, DH*DH)
    b2 = jnp.dot(zb, b2w_ref[...], preferred_element_type=f32) + b2b_ref[...]   # (B, DH)
    w3f = jnp.dot(zb, w3w_ref[...], preferred_element_type=f32) + w3b_ref[...]  # (B, A*DH)
    b3 = jnp.dot(zb, b3w_ref[...], preferred_element_type=f32) + b3b_ref[...]   # (B, A)

    # ---- Dynamic per-sample MLP (== the torch.bmm chain) ------------------------
    s = state_ref[...]                                                      # (B, POL_IN)
    h1 = jnp.maximum(_row_matvec(w1f, s, DYN_HID, POL_IN) + b1, 0.0)        # (B, DH)
    h2 = jnp.maximum(_row_matvec(w2f, h1, DYN_HID, DYN_HID) + b2, 0.0)      # (B, DH)
    out_ref[...] = _row_matvec(w3f, h2, ACTION_DIM, DYN_HID) + b3           # (B, A)


# ------------------------------- full forward --------------------------------
@jax.jit
def actor_forward(params, pooled_node_emb, T, base_v):
    # Glue (fused by XLA): embedding gathers + concatenations, batch=True path.
    node_idx = base_v[:, :-2]
    time_idx = base_v[:, -2]
    agent_id = base_v[:, -1]
    bn = node_idx.shape[0]
    node_emb = jnp.take(params['node_table'], node_idx, axis=0).reshape(bn, -1)
    time_emb = jnp.take(params['time_table'], time_idx, axis=0)
    agent_emb = jnp.take(params['agent_table'], agent_id, axis=0)
    state_emb = jnp.concatenate([node_emb, time_emb, agent_emb], axis=1)
    if USE_AUG:
        state_emb = jnp.concatenate([state_emb, pooled_node_emb], axis=1)   # (B, POL_IN)
    meta_v = jnp.concatenate([pooled_node_emb, T], axis=1)                  # (B, META)

    args = (meta_v, state_emb,
            params['wh1'], params['bh1'], params['wh2'], params['bh2'],
            params['w1w'], params['w1b'], params['b1w'], params['b1b'],
            params['w2w'], params['w2b'], params['b2w'], params['b2b'],
            params['w3w'], params['w3b'], params['b3w'], params['b3b'])

    out = pl.pallas_call(
        _actor_fused_kernel,
        out_shape=jax.ShapeDtypeStruct((bn, ACTION_DIM), jnp.float32),
        in_specs=_vmem_specs(len(args)),
        out_specs=pl.BlockSpec(memory_space=pltpu.MemorySpace.VMEM),
    )(*args)

    # torch: out = squeeze(out, dim=2) then out.squeeze(0)
    return jnp.squeeze(out, axis=0) if out.shape[0] == 1 else out


# --------------------------- pure-JAX reference -------------------------------
def reference_forward(params, pooled_node_emb, T, base_v):
    f32 = jnp.float32
    node_idx = base_v[:, :-2]
    time_idx = base_v[:, -2]
    agent_id = base_v[:, -1]
    bn = node_idx.shape[0]
    node_emb = params['node_table'][node_idx].reshape(bn, -1)
    time_emb = params['time_table'][time_idx]
    agent_emb = params['agent_table'][agent_id]
    state_emb = jnp.concatenate([node_emb, time_emb, agent_emb, pooled_node_emb], axis=1)
    meta_v = jnp.concatenate([pooled_node_emb, T], axis=1)

    h = jax.nn.relu(meta_v @ params['wh1'] + params['bh1'])
    z = h @ params['wh2'] + params['bh2']

    w1w = params['w1w'].astype(f32); b1w = params['b1w'].astype(f32)
    w2w = params['w2w'].astype(f32); b2w = params['b2w'].astype(f32)
    w3w = params['w3w'].astype(f32); b3w = params['b3w'].astype(f32)

    w1 = (z @ w1w + params['w1b']).reshape(bn, DYN_HID, POL_IN)
    b1 = (z @ b1w + params['b1b']).reshape(bn, DYN_HID, 1)
    w2 = (z @ w2w + params['w2b']).reshape(bn, DYN_HID, DYN_HID)
    b2 = (z @ b2w + params['b2b']).reshape(bn, DYN_HID, 1)
    w3 = (z @ w3w + params['w3b']).reshape(bn, ACTION_DIM, DYN_HID)
    b3 = (z @ b3w + params['b3b']).reshape(bn, ACTION_DIM, 1)

    out = jax.nn.relu(jnp.matmul(w1, state_emb[:, :, None]) + b1)
    out = jax.nn.relu(jnp.matmul(w2, out) + b2)
    out = jnp.matmul(w3, out) + b3
    out = out[:, :, 0]
    return jnp.squeeze(out, axis=0) if out.shape[0] == 1 else out


# -------------------------------- parameters ----------------------------------
def init_params(key):
    ks = jax.random.split(key, 16)
    bf16 = jnp.bfloat16

    def unif(k, shape, bound):
        return jax.random.uniform(k, shape, jnp.float32, -bound, bound)

    p = {}
    # Meta_Embadding: uniform(+-1/sqrt(2*fan_in)) weights, zero biases
    p['wh1'] = unif(ks[0], (META_DIM, HYPER_HID), 1.0 / math.sqrt(2 * META_DIM))
    p['bh1'] = jnp.zeros((1, HYPER_HID), jnp.float32)
    p['wh2'] = unif(ks[1], (HYPER_HID, Z_DIM), 1.0 / math.sqrt(2 * HYPER_HID))
    p['bh2'] = jnp.zeros((1, Z_DIM), jnp.float32)
    # Embedding tables (PyTorch default N(0,1))
    p['node_table'] = jax.random.normal(ks[2], (NODE_NUM + 1, STATE_EMB), jnp.float32)
    p['time_table'] = jax.random.normal(ks[3], (MAX_T, STATE_EMB), jnp.float32)
    p['agent_table'] = jax.random.normal(ks[4], (DEFENDER_NUM, STATE_EMB), jnp.float32)
    # Heads ('unif' init: uniform(+-stddev) weights, zero biases).
    # Weight-generator matrices stored in bf16 (only real HBM traffic of the kernel).
    p['w1w'] = unif(ks[5], (Z_DIM, DYN_HID * POL_IN), 0.05).astype(bf16)
    p['w1b'] = jnp.zeros((1, DYN_HID * POL_IN), jnp.float32)
    p['b1w'] = unif(ks[6], (Z_DIM, DYN_HID), 0.05).astype(bf16)
    p['b1b'] = jnp.zeros((1, DYN_HID), jnp.float32)
    p['w2w'] = unif(ks[7], (Z_DIM, DYN_HID * DYN_HID), 0.008).astype(bf16)
    p['w2b'] = jnp.zeros((1, DYN_HID * DYN_HID), jnp.float32)
    p['b2w'] = unif(ks[8], (Z_DIM, DYN_HID), 0.008).astype(bf16)
    p['b2b'] = jnp.zeros((1, DYN_HID), jnp.float32)
    p['w3w'] = unif(ks[9], (Z_DIM, ACTION_DIM * DYN_HID), 0.001).astype(bf16)
    p['w3b'] = jnp.zeros((1, ACTION_DIM * DYN_HID), jnp.float32)
    p['b3w'] = unif(ks[10], (Z_DIM, ACTION_DIM), 0.001).astype(bf16)
    p['b3b'] = jnp.zeros((1, ACTION_DIM), jnp.float32)
    return p


if __name__ == "__main__":
    key = jax.random.PRNGKey(0)
    kp, k1, k2, k3, k4, k5 = jax.random.split(key, 6)
    params = init_params(kp)

    pooled = jax.random.normal(k1, (B, GNN_DIM), jnp.float32)
    T = jax.random.normal(k2, (B, T_DIM), jnp.float32)
    node_idx = jax.random.randint(k3, (B, DEFENDER_NUM + 1), 0, NODE_NUM + 1)
    time_idx = jax.random.randint(k4, (B, 1), 0, MAX_T)
    agent_id = jax.random.randint(k5, (B, 1), 0, DEFENDER_NUM)
    base_v = jnp.concatenate([node_idx, time_idx, agent_id], axis=1).astype(jnp.int32)

    out = actor_forward(params, pooled, T, base_v)
    out = jax.block_until_ready(out)
    ref = reference_forward(params, pooled, T, base_v)

    assert out.shape == (B, ACTION_DIM), out.shape
    # Tolerance is loose-ish because the kernel intentionally runs the head matmuls
    # through a bf16 MXU path (f32 accumulate) while the reference runs pure f32;
    # output magnitudes are ~1e-4 (head stddev 0.001), so atol=1e-4 is still tight
    # relative to the expected bf16 error (~1e-5 worst case).
    if not jnp.allclose(out, ref, rtol=2e-2, atol=1e-4):
        diff = jnp.max(jnp.abs(out - ref))
        raise AssertionError(f"kernel/reference mismatch (max abs diff {diff}):\n{out}\nvs\n{ref}")
    print("KERNEL_OK")
</pallas_src>

<mosaic_0001>
module attributes {stable_mosaic.version = 11 : i64} {
  func.func @_actor_fused_kernel(%arg0: memref<2x32xf32, #tpu.memory_space<vmem>>, %arg1: memref<2x56xf32, #tpu.memory_space<vmem>>, %arg2: memref<32x32xf32, #tpu.memory_space<vmem>>, %arg3: memref<1x32xf32, #tpu.memory_space<vmem>>, %arg4: memref<32x32xf32, #tpu.memory_space<vmem>>, %arg5: memref<1x32xf32, #tpu.memory_space<vmem>>, %arg6: memref<32x1792xbf16, #tpu.memory_space<vmem>>, %arg7: memref<1x1792xf32, #tpu.memory_space<vmem>>, %arg8: memref<32x32xbf16, #tpu.memory_space<vmem>>, %arg9: memref<1x32xf32, #tpu.memory_space<vmem>>, %arg10: memref<32x1024xbf16, #tpu.memory_space<vmem>>, %arg11: memref<1x1024xf32, #tpu.memory_space<vmem>>, %arg12: memref<32x32xbf16, #tpu.memory_space<vmem>>, %arg13: memref<1x32xf32, #tpu.memory_space<vmem>>, %arg14: memref<32x352xbf16, #tpu.memory_space<vmem>>, %arg15: memref<1x352xf32, #tpu.memory_space<vmem>>, %arg16: memref<32x11xbf16, #tpu.memory_space<vmem>>, %arg17: memref<1x11xf32, #tpu.memory_space<vmem>>, %arg18: memref<2x11xf32, #tpu.memory_space<vmem>>) attributes {dimension_semantics = [], scalar_prefetch = 0 : i64, scratch_operands = 0 : i64, tpu.core_type = #tpu.core_type<tc>} {
    %c0 = arith.constant 0 : index
    %c0_0 = arith.constant 0 : index
    %0 = vector.load %arg0[%c0, %c0_0] : memref<2x32xf32, #tpu.memory_space<vmem>>, vector<2x32xf32>
    %c0_1 = arith.constant 0 : index
    %c0_2 = arith.constant 0 : index
    %1 = vector.load %arg2[%c0_1, %c0_2] : memref<32x32xf32, #tpu.memory_space<vmem>>, vector<32x32xf32>
    %cst = arith.constant dense<0.000000e+00> : vector<2x32xf32>
    %2 = tpu.matmul %0, %1, %cst {dimension_numbers = #tpu.dot_dimension_numbers<[1], [0], [0], [1], [0, 0, 1, 1], [], []>} : vector<2x32xf32>, vector<32x32xf32>, vector<2x32xf32> -> vector<2x32xf32>
    %c0_3 = arith.constant 0 : index
    %c0_4 = arith.constant 0 : index
    %3 = vector.load %arg3[%c0_3, %c0_4] : memref<1x32xf32, #tpu.memory_space<vmem>>, vector<1x32xf32>
    %4 = vector.broadcast %3 : vector<1x32xf32> to vector<2x32xf32>
    %5 = arith.addf %2, %4 : vector<2x32xf32>
    %cst_5 = arith.constant 0.000000e+00 : f32
    %6 = vector.broadcast %cst_5 : f32 to vector<2x32xf32>
    %7 = arith.maximumf %5, %6 : vector<2x32xf32>
    %c0_6 = arith.constant 0 : index
    %c0_7 = arith.constant 0 : index
    %8 = vector.load %arg4[%c0_6, %c0_7] : memref<32x32xf32, #tpu.memory_space<vmem>>, vector<32x32xf32>
    %cst_8 = arith.constant dense<0.000000e+00> : vector<2x32xf32>
    %9 = tpu.matmul %7, %8, %cst_8 {dimension_numbers = #tpu.dot_dimension_numbers<[1], [0], [0], [1], [0, 0, 1, 1], [], []>} : vector<2x32xf32>, vector<32x32xf32>, vector<2x32xf32> -> vector<2x32xf32>
    %c0_9 = arith.constant 0 : index
    %c0_10 = arith.constant 0 : index
    %10 = vector.load %arg5[%c0_9, %c0_10] : memref<1x32xf32, #tpu.memory_space<vmem>>, vector<1x32xf32>
    %11 = vector.broadcast %10 : vector<1x32xf32> to vector<2x32xf32>
    %12 = arith.addf %9, %11 : vector<2x32xf32>
    %13 = arith.truncf %12 : vector<2x32xf32> to vector<2x32xbf16>
    %c0_11 = arith.constant 0 : index
    %c0_12 = arith.constant 0 : index
    %14 = vector.load %arg6[%c0_11, %c0_12] : memref<32x1792xbf16, #tpu.memory_space<vmem>>, vector<32x1792xbf16>
    %cst_13 = arith.constant dense<0.000000e+00> : vector<2x1792xf32>
    %15 = tpu.matmul %13, %14, %cst_13 {dimension_numbers = #tpu.dot_dimension_numbers<[1], [0], [0], [1], [0, 0, 1, 1], [], []>} : vector<2x32xbf16>, vector<32x1792xbf16>, vector<2x1792xf32> -> vector<2x1792xf32>
    %c0_14 = arith.constant 0 : index
    %c0_15 = arith.constant 0 : index
    %16 = vector.load %arg7[%c0_14, %c0_15] : memref<1x1792xf32, #tpu.memory_space<vmem>>, vector<1x1792xf32>
    %17 = vector.broadcast %16 : vector<1x1792xf32> to vector<2x1792xf32>
    %18 = arith.addf %15, %17 : vector<2x1792xf32>
    %c0_16 = arith.constant 0 : index
    %c0_17 = arith.constant 0 : index
    %19 = vector.load %arg8[%c0_16, %c0_17] : memref<32x32xbf16, #tpu.memory_space<vmem>>, vector<32x32xbf16>
    %cst_18 = arith.constant dense<0.000000e+00> : vector<2x32xf32>
    %20 = tpu.matmul %13, %19, %cst_18 {dimension_numbers = #tpu.dot_dimension_numbers<[1], [0], [0], [1], [0, 0, 1, 1], [], []>} : vector<2x32xbf16>, vector<32x32xbf16>, vector<2x32xf32> -> vector<2x32xf32>
    %c0_19 = arith.constant 0 : index
    %c0_20 = arith.constant 0 : index
    %21 = vector.load %arg9[%c0_19, %c0_20] : memref<1x32xf32, #tpu.memory_space<vmem>>, vector<1x32xf32>
    %22 = vector.broadcast %21 : vector<1x32xf32> to vector<2x32xf32>
    %23 = arith.addf %20, %22 : vector<2x32xf32>
    %c0_21 = arith.constant 0 : index
    %c0_22 = arith.constant 0 : index
    %24 = vector.load %arg10[%c0_21, %c0_22] : memref<32x1024xbf16, #tpu.memory_space<vmem>>, vector<32x1024xbf16>
    %cst_23 = arith.constant dense<0.000000e+00> : vector<2x1024xf32>
    %25 = tpu.matmul %13, %24, %cst_23 {dimension_numbers = #tpu.dot_dimension_numbers<[1], [0], [0], [1], [0, 0, 1, 1], [], []>} : vector<2x32xbf16>, vector<32x1024xbf16>, vector<2x1024xf32> -> vector<2x1024xf32>
    %c0_24 = arith.constant 0 : index
    %c0_25 = arith.constant 0 : index
    %26 = vector.load %arg11[%c0_24, %c0_25] : memref<1x1024xf32, #tpu.memory_space<vmem>>, vector<1x1024xf32>
    %27 = vector.broadcast %26 : vector<1x1024xf32> to vector<2x1024xf32>
    %28 = arith.addf %25, %27 : vector<2x1024xf32>
    %c0_26 = arith.constant 0 : index
    %c0_27 = arith.constant 0 : index
    %29 = vector.load %arg12[%c0_26, %c0_27] : memref<32x32xbf16, #tpu.memory_space<vmem>>, vector<32x32xbf16>
    %cst_28 = arith.constant dense<0.000000e+00> : vector<2x32xf32>
    %30 = tpu.matmul %13, %29, %cst_28 {dimension_numbers = #tpu.dot_dimension_numbers<[1], [0], [0], [1], [0, 0, 1, 1], [], []>} : vector<2x32xbf16>, vector<32x32xbf16>, vector<2x32xf32> -> vector<2x32xf32>
    %c0_29 = arith.constant 0 : index
    %c0_30 = arith.constant 0 : index
    %31 = vector.load %arg13[%c0_29, %c0_30] : memref<1x32xf32, #tpu.memory_space<vmem>>, vector<1x32xf32>
    %32 = vector.broadcast %31 : vector<1x32xf32> to vector<2x32xf32>
    %33 = arith.addf %30, %32 : vector<2x32xf32>
    %c0_31 = arith.constant 0 : index
    %c0_32 = arith.constant 0 : index
    %34 = vector.load %arg14[%c0_31, %c0_32] : memref<32x352xbf16, #tpu.memory_space<vmem>>, vector<32x352xbf16>
    %cst_33 = arith.constant dense<0.000000e+00> : vector<2x352xf32>
    %35 = tpu.matmul %13, %34, %cst_33 {dimension_numbers = #tpu.dot_dimension_numbers<[1], [0], [0], [1], [0, 0, 1, 1], [], []>} : vector<2x32xbf16>, vector<32x352xbf16>, vector<2x352xf32> -> vector<2x352xf32>
    %c0_34 = arith.constant 0 : index
    %c0_35 = arith.constant 0 : index
    %36 = vector.load %arg15[%c0_34, %c0_35] : memref<1x352xf32, #tpu.memory_space<vmem>>, vector<1x352xf32>
    %37 = vector.broadcast %36 : vector<1x352xf32> to vector<2x352xf32>
    %38 = arith.addf %35, %37 : vector<2x352xf32>
    %c0_36 = arith.constant 0 : index
    %c0_37 = arith.constant 0 : index
    %39 = vector.load %arg16[%c0_36, %c0_37] : memref<32x11xbf16, #tpu.memory_space<vmem>>, vector<32x11xbf16>
    %cst_38 = arith.constant dense<0.000000e+00> : vector<2x11xf32>
    %40 = tpu.matmul %13, %39, %cst_38 {dimension_numbers = #tpu.dot_dimension_numbers<[1], [0], [0], [1], [0, 0, 1, 1], [], []>} : vector<2x32xbf16>, vector<32x11xbf16>, vector<2x11xf32> -> vector<2x11xf32>
    %c0_39 = arith.constant 0 : index
    %c0_40 = arith.constant 0 : index
    %41 = vector.load %arg17[%c0_39, %c0_40] : memref<1x11xf32, #tpu.memory_space<vmem>>, vector<1x11xf32>
    %42 = vector.broadcast %41 : vector<1x11xf32> to vector<2x11xf32>
    %43 = arith.addf %40, %42 : vector<2x11xf32>
    %c0_41 = arith.constant 0 : index
    %c0_42 = arith.constant 0 : index
    %44 = vector.load %arg1[%c0_41, %c0_42] : memref<2x56xf32, #tpu.memory_space<vmem>>, vector<2x56xf32>
    %45 = vector.extract_strided_slice %18 {offsets = [0, 0], sizes = [2, 56], strides = [1, 1]} : vector<2x1792xf32> to vector<2x56xf32>
    %46 = arith.mulf %45, %44 : vector<2x56xf32>
    %cst_43 = arith.constant dense<0.000000e+00> : vector<2xf32>
    %47 = vector.multi_reduction <add>, %46, %cst_43 [1] : vector<2x56xf32> to vector<2xf32>
    %48 = vector.shape_cast %47 : vector<2xf32> to vector<2x1xf32>
    %49 = vector.extract_strided_slice %18 {offsets = [0, 56], sizes = [2, 56], strides = [1, 1]} : vector<2x1792xf32> to vector<2x56xf32>
    %50 = arith.mulf %49, %44 : vector<2x56xf32>
    %cst_44 = arith.constant dense<0.000000e+00> : vector<2xf32>
    %51 = vector.multi_reduction <add>, %50, %cst_44 [1] : vector<2x56xf32> to vector<2xf32>
    %52 = vector.shape_cast %51 : vector<2xf32> to vector<2x1xf32>
    %53 = vector.extract_strided_slice %18 {offsets = [0, 112], sizes = [2, 56], strides = [1, 1]} : vector<2x1792xf32> to vector<2x56xf32>
    %54 = arith.mulf %53, %44 : vector<2x56xf32>
    %cst_45 = arith.constant dense<0.000000e+00> : vector<2xf32>
    %55 = vector.multi_reduction <add>, %54, %cst_45 [1] : vector<2x56xf32> to vector<2xf32>
    %56 = vector.shape_cast %55 : vector<2xf32> to vector<2x1xf32>
    %57 = vector.extract_strided_slice %18 {offsets = [0, 168], sizes = [2, 56], strides = [1, 1]} : vector<2x1792xf32> to vector<2x56xf32>
    %58 = arith.mulf %57, %44 : vector<2x56xf32>
    %cst_46 = arith.constant dense<0.000000e+00> : vector<2xf32>
    %59 = vector.multi_reduction <add>, %58, %cst_46 [1] : vector<2x56xf32> to vector<2xf32>
    %60 = vector.shape_cast %59 : vector<2xf32> to vector<2x1xf32>
    %61 = vector.extract_strided_slice %18 {offsets = [0, 224], sizes = [2, 56], strides = [1, 1]} : vector<2x1792xf32> to vector<2x56xf32>
    %62 = arith.mulf %61, %44 : vector<2x56xf32>
    %cst_47 = arith.constant dense<0.000000e+00> : vector<2xf32>
    %63 = vector.multi_reduction <add>, %62, %cst_47 [1] : vector<2x56xf32> to vector<2xf32>
    %64 = vector.shape_cast %63 : vector<2xf32> to vector<2x1xf32>
    %65 = vector.extract_strided_slice %18 {offsets = [0, 280], sizes = [2, 56], strides = [1, 1]} : vector<2x1792xf32> to vector<2x56xf32>
    %66 = arith.mulf %65, %44 : vector<2x56xf32>
    %cst_48 = arith.constant dense<0.000000e+00> : vector<2xf32>
    %67 = vector.multi_reduction <add>, %66, %cst_48 [1] : vector<2x56xf32> to vector<2xf32>
    %68 = vector.shape_cast %67 : vector<2xf32> to vector<2x1xf32>
    %69 = vector.extract_strided_slice %18 {offsets = [0, 336], sizes = [2, 56], strides = [1, 1]} : vector<2x1792xf32> to vector<2x56xf32>
    %70 = arith.mulf %69, %44 : vector<2x56xf32>
    %cst_49 = arith.constant dense<0.000000e+00> : vector<2xf32>
    %71 = vector.multi_reduction <add>, %70, %cst_49 [1] : vector<2x56xf32> to vector<2xf32>
    %72 = vector.shape_cast %71 : vector<2xf32> to vector<2x1xf32>
    %73 = vector.extract_strided_slice %18 {offsets = [0, 392], sizes = [2, 56], strides = [1, 1]} : vector<2x1792xf32> to vector<2x56xf32>
    %74 = arith.mulf %73, %44 : vector<2x56xf32>
    %cst_50 = arith.constant dense<0.000000e+00> : vector<2xf32>
    %75 = vector.multi_reduction <add>, %74, %cst_50 [1] : vector<2x56xf32> to vector<2xf32>
    %76 = vector.shape_cast %75 : vector<2xf32> to vector<2x1xf32>
    %77 = vector.extract_strided_slice %18 {offsets = [0, 448], sizes = [2, 56], strides = [1, 1]} : vector<2x1792xf32> to vector<2x56xf32>
    %78 = arith.mulf %77, %44 : vector<2x56xf32>
    %cst_51 = arith.constant dense<0.000000e+00> : vector<2xf32>
    %79 = vector.multi_reduction <add>, %78, %cst_51 [1] : vector<2x56xf32> to vector<2xf32>
    %80 = vector.shape_cast %79 : vector<2xf32> to vector<2x1xf32>
    %81 = vector.extract_strided_slice %18 {offsets = [0, 504], sizes = [2, 56], strides = [1, 1]} : vector<2x1792xf32> to vector<2x56xf32>
    %82 = arith.mulf %81, %44 : vector<2x56xf32>
    %cst_52 = arith.constant dense<0.000000e+00> : vector<2xf32>
    %83 = vector.multi_reduction <add>, %82, %cst_52 [1] : vector<2x56xf32> to vector<2xf32>
    %84 = vector.shape_cast %83 : vector<2xf32> to vector<2x1xf32>
    %85 = vector.extract_strided_slice %18 {offsets = [0, 560], sizes = [2, 56], strides = [1, 1]} : vector<2x1792xf32> to vector<2x56xf32>
    %86 = arith.mulf %85, %44 : vector<2x56xf32>
    %cst_53 = arith.constant dense<0.000000e+00> : vector<2xf32>
    %87 = vector.multi_reduction <add>, %86, %cst_53 [1] : vector<2x56xf32> to vector<2xf32>
    %88 = vector.shape_cast %87 : vector<2xf32> to vector<2x1xf32>
    %89 = vector.extract_strided_slice %18 {offsets = [0, 616], sizes = [2, 56], strides = [1, 1]} : vector<2x1792xf32> to vector<2x56xf32>
    %90 = arith.mulf %89, %44 : vector<2x56xf32>
    %cst_54 = arith.constant dense<0.000000e+00> : vector<2xf32>
    %91 = vector.multi_reduction <add>, %90, %cst_54 [1] : vector<2x56xf32> to vector<2xf32>
    %92 = vector.shape_cast %91 : vector<2xf32> to vector<2x1xf32>
    %93 = vector.extract_strided_slice %18 {offsets = [0, 672], sizes = [2, 56], strides = [1, 1]} : vector<2x1792xf32> to vector<2x56xf32>
    %94 = arith.mulf %93, %44 : vector<2x56xf32>
    %cst_55 = arith.constant dense<0.000000e+00> : vector<2xf32>
    %95 = vector.multi_reduction <add>, %94, %cst_55 [1] : vector<2x56xf32> to vector<2xf32>
    %96 = vector.shape_cast %95 : vector<2xf32> to vector<2x1xf32>
    %97 = vector.extract_strided_slice %18 {offsets = [0, 728], sizes = [2, 56], strides = [1, 1]} : vector<2x1792xf32> to vector<2x56xf32>
    %98 = arith.mulf %97, %44 : vector<2x56xf32>
    %cst_56 = arith.constant dense<0.000000e+00> : vector<2xf32>
    %99 = vector.multi_reduction <add>, %98, %cst_56 [1] : vector<2x56xf32> to vector<2xf32>
    %100 = vector.shape_cast %99 : vector<2xf32> to vector<2x1xf32>
    %101 = vector.extract_strided_slice %18 {offsets = [0, 784], sizes = [2, 56], strides = [1, 1]} : vector<2x1792xf32> to vector<2x56xf32>
    %102 = arith.mulf %101, %44 : vector<2x56xf32>
    %cst_57 = arith.constant dense<0.000000e+00> : vector<2xf32>
    %103 = vector.multi_reduction <add>, %102, %cst_57 [1] : vector<2x56xf32> to vector<2xf32>
    %104 = vector.shape_cast %103 : vector<2xf32> to vector<2x1xf32>
    %105 = vector.extract_strided_slice %18 {offsets = [0, 840], sizes = [2, 56], strides = [1, 1]} : vector<2x1792xf32> to vector<2x56xf32>
    %106 = arith.mulf %105, %44 : vector<2x56xf32>
    %cst_58 = arith.constant dense<0.000000e+00> : vector<2xf32>
    %107 = vector.multi_reduction <add>, %106, %cst_58 [1] : vector<2x56xf32> to vector<2xf32>
    %108 = vector.shape_cast %107 : vector<2xf32> to vector<2x1xf32>
    %109 = vector.extract_strided_slice %18 {offsets = [0, 896], sizes = [2, 56], strides = [1, 1]} : vector<2x1792xf32> to vector<2x56xf32>
    %110 = arith.mulf %109, %44 : vector<2x56xf32>
    %cst_59 = arith.constant dense<0.000000e+00> : vector<2xf32>
    %111 = vector.multi_reduction <add>, %110, %cst_59 [1] : vector<2x56xf32> to vector<2xf32>
    %112 = vector.shape_cast %111 : vector<2xf32> to vector<2x1xf32>
    %113 = vector.extract_strided_slice %18 {offsets = [0, 952], sizes = [2, 56], strides = [1, 1]} : vector<2x1792xf32> to vector<2x56xf32>
    %114 = arith.mulf %113, %44 : vector<2x56xf32>
    %cst_60 = arith.constant dense<0.000000e+00> : vector<2xf32>
    %115 = vector.multi_reduction <add>, %114, %cst_60 [1] : vector<2x56xf32> to vector<2xf32>
    %116 = vector.shape_cast %115 : vector<2xf32> to vector<2x1xf32>
    %117 = vector.extract_strided_slice %18 {offsets = [0, 1008], sizes = [2, 56], strides = [1, 1]} : vector<2x1792xf32> to vector<2x56xf32>
    %118 = arith.mulf %117, %44 : vector<2x56xf32>
    %cst_61 = arith.constant dense<0.000000e+00> : vector<2xf32>
    %119 = vector.multi_reduction <add>, %118, %cst_61 [1] : vector<2x56xf32> to vector<2xf32>
    %120 = vector.shape_cast %119 : vector<2xf32> to vector<2x1xf32>
    %121 = vector.extract_strided_slice %18 {offsets = [0, 1064], sizes = [2, 56], strides = [1, 1]} : vector<2x1792xf32> to vector<2x56xf32>
    %122 = arith.mulf %121, %44 : vector<2x56xf32>
    %cst_62 = arith.constant dense<0.000000e+00> : vector<2xf32>
    %123 = vector.multi_reduction <add>, %122, %cst_62 [1] : vector<2x56xf32> to vector<2xf32>
    %124 = vector.shape_cast %123 : vector<2xf32> to vector<2x1xf32>
    %125 = vector.extract_strided_slice %18 {offsets = [0, 1120], sizes = [2, 56], strides = [1, 1]} : vector<2x1792xf32> to vector<2x56xf32>
    %126 = arith.mulf %125, %44 : vector<2x56xf32>
    %cst_63 = arith.constant dense<0.000000e+00> : vector<2xf32>
    %127 = vector.multi_reduction <add>, %126, %cst_63 [1] : vector<2x56xf32> to vector<2xf32>
    %128 = vector.shape_cast %127 : vector<2xf32> to vector<2x1xf32>
    %129 = vector.extract_strided_slice %18 {offsets = [0, 1176], sizes = [2, 56], strides = [1, 1]} : vector<2x1792xf32> to vector<2x56xf32>
    %130 = arith.mulf %129, %44 : vector<2x56xf32>
    %cst_64 = arith.constant dense<0.000000e+00> : vector<2xf32>
    %131 = vector.multi_reduction <add>, %130, %cst_64 [1] : vector<2x56xf32> to vector<2xf32>
    %132 = vector.shape_cast %131 : vector<2xf32> to vector<2x1xf32>
    %133 = vector.extract_strided_slice %18 {offsets = [0, 1232], sizes = [2, 56], strides = [1, 1]} : vector<2x1792xf32> to vector<2x56xf32>
    %134 = arith.mulf %133, %44 : vector<2x56xf32>
    %cst_65 = arith.constant dense<0.000000e+00> : vector<2xf32>
    %135 = vector.multi_reduction <add>, %134, %cst_65 [1] : vector<2x56xf32> to vector<2xf32>
    %136 = vector.shape_cast %135 : vector<2xf32> to vector<2x1xf32>
    %137 = vector.extract_strided_slice %18 {offsets = [0, 1288], sizes = [2, 56], strides = [1, 1]} : vector<2x1792xf32> to vector<2x56xf32>
    %138 = arith.mulf %137, %44 : vector<2x56xf32>
    %cst_66 = arith.constant dense<0.000000e+00> : vector<2xf32>
    %139 = vector.multi_reduction <add>, %138, %cst_66 [1] : vector<2x56xf32> to vector<2xf32>
    %140 = vector.shape_cast %139 : vector<2xf32> to vector<2x1xf32>
    %141 = vector.extract_strided_slice %18 {offsets = [0, 1344], sizes = [2, 56], strides = [1, 1]} : vector<2x1792xf32> to vector<2x56xf32>
    %142 = arith.mulf %141, %44 : vector<2x56xf32>
    %cst_67 = arith.constant dense<0.000000e+00> : vector<2xf32>
    %143 = vector.multi_reduction <add>, %142, %cst_67 [1] : vector<2x56xf32> to vector<2xf32>
    %144 = vector.shape_cast %143 : vector<2xf32> to vector<2x1xf32>
    %145 = vector.extract_strided_slice %18 {offsets = [0, 1400], sizes = [2, 56], strides = [1, 1]} : vector<2x1792xf32> to vector<2x56xf32>
    %146 = arith.mulf %145, %44 : vector<2x56xf32>
    %cst_68 = arith.constant dense<0.000000e+00> : vector<2xf32>
    %147 = vector.multi_reduction <add>, %146, %cst_68 [1] : vector<2x56xf32> to vector<2xf32>
    %148 = vector.shape_cast %147 : vector<2xf32> to vector<2x1xf32>
    %149 = vector.extract_strided_slice %18 {offsets = [0, 1456], sizes = [2, 56], strides = [1, 1]} : vector<2x1792xf32> to vector<2x56xf32>
    %150 = arith.mulf %149, %44 : vector<2x56xf32>
    %cst_69 = arith.constant dense<0.000000e+00> : vector<2xf32>
    %151 = vector.multi_reduction <add>, %150, %cst_69 [1] : vector<2x56xf32> to vector<2xf32>
    %152 = vector.shape_cast %151 : vector<2xf32> to vector<2x1xf32>
    %153 = vector.extract_strided_slice %18 {offsets = [0, 1512], sizes = [2, 56], strides = [1, 1]} : vector<2x1792xf32> to vector<2x56xf32>
    %154 = arith.mulf %153, %44 : vector<2x56xf32>
    %cst_70 = arith.constant dense<0.000000e+00> : vector<2xf32>
    %155 = vector.multi_reduction <add>, %154, %cst_70 [1] : vector<2x56xf32> to vector<2xf32>
    %156 = vector.shape_cast %155 : vector<2xf32> to vector<2x1xf32>
    %157 = vector.extract_strided_slice %18 {offsets = [0, 1568], sizes = [2, 56], strides = [1, 1]} : vector<2x1792xf32> to vector<2x56xf32>
    %158 = arith.mulf %157, %44 : vector<2x56xf32>
    %cst_71 = arith.constant dense<0.000000e+00> : vector<2xf32>
    %159 = vector.multi_reduction <add>, %158, %cst_71 [1] : vector<2x56xf32> to vector<2xf32>
    %160 = vector.shape_cast %159 : vector<2xf32> to vector<2x1xf32>
    %161 = vector.extract_strided_slice %18 {offsets = [0, 1624], sizes = [2, 56], strides = [1, 1]} : vector<2x1792xf32> to vector<2x56xf32>
    %162 = arith.mulf %161, %44 : vector<2x56xf32>
    %cst_72 = arith.constant dense<0.000000e+00> : vector<2xf32>
    %163 = vector.multi_reduction <add>, %162, %cst_72 [1] : vector<2x56xf32> to vector<2xf32>
    %164 = vector.shape_cast %163 : vector<2xf32> to vector<2x1xf32>
    %165 = vector.extract_strided_slice %18 {offsets = [0, 1680], sizes = [2, 56], strides = [1, 1]} : vector<2x1792xf32> to vector<2x56xf32>
    %166 = arith.mulf %165, %44 : vector<2x56xf32>
    %cst_73 = arith.constant dense<0.000000e+00> : vector<2xf32>
    %167 = vector.multi_reduction <add>, %166, %cst_73 [1] : vector<2x56xf32> to vector<2xf32>
    %168 = vector.shape_cast %167 : vector<2xf32> to vector<2x1xf32>
    %169 = vector.extract_strided_slice %18 {offsets = [0, 1736], sizes = [2, 56], strides = [1, 1]} : vector<2x1792xf32> to vector<2x56xf32>
    %170 = arith.mulf %169, %44 : vector<2x56xf32>
    %cst_74 = arith.constant dense<0.000000e+00> : vector<2xf32>
    %171 = vector.multi_reduction <add>, %170, %cst_74 [1] : vector<2x56xf32> to vector<2xf32>
    %172 = vector.shape_cast %171 : vector<2xf32> to vector<2x1xf32>
    %173 = tpu.concatenate %48, %52, %56, %60, %64, %68, %72, %76, %80, %84, %88, %92, %96, %100, %104, %108 in 1 : vector<2x1xf32>, vector<2x1xf32>, vector<2x1xf32>, vector<2x1xf32>, vector<2x1xf32>, vector<2x1xf32>, vector<2x1xf32>, vector<2x1xf32>, vector<2x1xf32>, vector<2x1xf32>, vector<2x1xf32>, vector<2x1xf32>, vector<2x1xf32>, vector<2x1xf32>, vector<2x1xf32>, vector<2x1xf32> -> vector<2x16xf32>
    %174 = tpu.concatenate %112, %116, %120, %124, %128, %132, %136, %140, %144, %148, %152, %156, %160, %164, %168, %172 in 1 : vector<2x1xf32>, vector<2x1xf32>, vector<2x1xf32>, vector<2x1xf32>, vector<2x1xf32>, vector<2x1xf32>, vector<2x1xf32>, vector<2x1xf32>, vector<2x1xf32>, vector<2x1xf32>, vector<2x1xf32>, vector<2x1xf32>, vector<2x1xf32>, vector<2x1xf32>, vector<2x1xf32>, vector<2x1xf32> -> vector<2x16xf32>
    %175 = tpu.concatenate %173, %174 in 1 : vector<2x16xf32>, vector<2x16xf32> -> vector<2x32xf32>
    %176 = arith.addf %175, %23 : vector<2x32xf32>
    %cst_75 = arith.constant 0.000000e+00 : f32
    %177 = vector.broadcast %cst_75 : f32 to vector<2x32xf32>
    %178 = arith.maximumf %176, %177 : vector<2x32xf32>
    %179 = vector.extract_strided_slice %28 {offsets = [0, 0], sizes = [2, 32], strides = [1, 1]} : vector<2x1024xf32> to vector<2x32xf32>
    %180 = arith.mulf %179, %178 : vector<2x32xf32>
    %cst_76 = arith.constant dense<0.000000e+00> : vector<2xf32>
    %181 = vector.multi_reduction <add>, %180, %cst_76 [1] : vector<2x32xf32> to vector<2xf32>
    %182 = vector.shape_cast %181 : vector<2xf32> to vector<2x1xf32>
    %183 = vector.extract_strided_slice %28 {offsets = [0, 32], sizes = [2, 32], strides = [1, 1]} : vector<2x1024xf32> to vector<2x32xf32>
    %184 = arith.mulf %183, %178 : vector<2x32xf32>
    %cst_77 = arith.constant dense<0.000000e+00> : vector<2xf32>
    %185 = vector.multi_reduction <add>, %184, %cst_77 [1] : vector<2x32xf32> to vector<2xf32>
    %186 = vector.shape_cast %185 : vector<2xf32> to vector<2x1xf32>
    %187 = vector.extract_strided_slice %28 {offsets = [0, 64], sizes = [2, 32], strides = [1, 1]} : vector<2x1024xf32> to vector<2x32xf32>
    %188 = arith.mulf %187, %178 : vector<2x32xf32>
    %cst_78 = arith.constant dense<0.000000e+00> : vector<2xf32>
    %189 = vector.multi_reduction <add>, %188, %cst_78 [1] : vector<2x32xf32> to vector<2xf32>
    %190 = vector.shape_cast %189 : vector<2xf32> to vector<2x1xf32>
    %191 = vector.extract_strided_slice %28 {offsets = [0, 96], sizes = [2, 32], strides = [1, 1]} : vector<2x1024xf32> to vector<2x32xf32>
    %192 = arith.mulf %191, %178 : vector<2x32xf32>
    %cst_79 = arith.constant dense<0.000000e+00> : vector<2xf32>
    %193 = vector.multi_reduction <add>, %192, %cst_79 [1] : vector<2x32xf32> to vector<2xf32>
    %194 = vector.shape_cast %193 : vector<2xf32> to vector<2x1xf32>
    %195 = vector.extract_strided_slice %28 {offsets = [0, 128], sizes = [2, 32], strides = [1, 1]} : vector<2x1024xf32> to vector<2x32xf32>
    %196 = arith.mulf %195, %178 : vector<2x32xf32>
    %cst_80 = arith.constant dense<0.000000e+00> : vector<2xf32>
    %197 = vector.multi_reduction <add>, %196, %cst_80 [1] : vector<2x32xf32> to vector<2xf32>
    %198 = vector.shape_cast %197 : vector<2xf32> to vector<2x1xf32>
    %199 = vector.extract_strided_slice %28 {offsets = [0, 160], sizes = [2, 32], strides = [1, 1]} : vector<2x1024xf32> to vector<2x32xf32>
    %200 = arith.mulf %199, %178 : vector<2x32xf32>
    %cst_81 = arith.constant dense<0.000000e+00> : vector<2xf32>
    %201 = vector.multi_reduction <add>, %200, %cst_81 [1] : vector<2x32xf32> to vector<2xf32>
    %202 = vector.shape_cast %201 : vector<2xf32> to vector<2x1xf32>
    %203 = vector.extract_strided_slice %28 {offsets = [0, 192], sizes = [2, 32], strides = [1, 1]} : vector<2x1024xf32> to vector<2x32xf32>
    %204 = arith.mulf %203, %178 : vector<2x32xf32>
    %cst_82 = arith.constant dense<0.000000e+00> : vector<2xf32>
    %205 = vector.multi_reduction <add>, %204, %cst_82 [1] : vector<2x32xf32> to vector<2xf32>
    %206 = vector.shape_cast %205 : vector<2xf32> to vector<2x1xf32>
    %207 = vector.extract_strided_slice %28 {offsets = [0, 224], sizes = [2, 32], strides = [1, 1]} : vector<2x1024xf32> to vector<2x32xf32>
    %208 = arith.mulf %207, %178 : vector<2x32xf32>
    %cst_83 = arith.constant dense<0.000000e+00> : vector<2xf32>
    %209 = vector.multi_reduction <add>, %208, %cst_83 [1] : vector<2x32xf32> to vector<2xf32>
    %210 = vector.shape_cast %209 : vector<2xf32> to vector<2x1xf32>
    %211 = vector.extract_strided_slice %28 {offsets = [0, 256], sizes = [2, 32], strides = [1, 1]} : vector<2x1024xf32> to vector<2x32xf32>
    %212 = arith.mulf %211, %178 : vector<2x32xf32>
    %cst_84 = arith.constant dense<0.000000e+00> : vector<2xf32>
    %213 = vector.multi_reduction <add>, %212, %cst_84 [1] : vector<2x32xf32> to vector<2xf32>
    %214 = vector.shape_cast %213 : vector<2xf32> to vector<2x1xf32>
    %215 = vector.extract_strided_slice %28 {offsets = [0, 288], sizes = [2, 32], strides = [1, 1]} : vector<2x1024xf32> to vector<2x32xf32>
    %216 = arith.mulf %215, %178 : vector<2x32xf32>
    %cst_85 = arith.constant dense<0.000000e+00> : vector<2xf32>
    %217 = vector.multi_reduction <add>, %216, %cst_85 [1] : vector<2x32xf32> to vector<2xf32>
    %218 = vector.shape_cast %217 : vector<2xf32> to vector<2x1xf32>
    %219 = vector.extract_strided_slice %28 {offsets = [0, 320], sizes = [2, 32], strides = [1, 1]} : vector<2x1024xf32> to vector<2x32xf32>
    %220 = arith.mulf %219, %178 : vector<2x32xf32>
    %cst_86 = arith.constant dense<0.000000e+00> : vector<2xf32>
    %221 = vector.multi_reduction <add>, %220, %cst_86 [1] : vector<2x32xf32> to vector<2xf32>
    %222 = vector.shape_cast %221 : vector<2xf32> to vector<2x1xf32>
    %223 = vector.extract_strided_slice %28 {offsets = [0, 352], sizes = [2, 32], strides = [1, 1]} : vector<2x1024xf32> to vector<2x32xf32>
    %224 = arith.mulf %223, %178 : vector<2x32xf32>
    %cst_87 = arith.constant dense<0.000000e+00> : vector<2xf32>
    %225 = vector.multi_reduction <add>, %224, %cst_87 [1] : vector<2x32xf32> to vector<2xf32>
    %226 = vector.shape_cast %225 : vector<2xf32> to vector<2x1xf32>
    %227 = vector.extract_strided_slice %28 {offsets = [0, 384], sizes = [2, 32], strides = [1, 1]} : vector<2x1024xf32> to vector<2x32xf32>
    %228 = arith.mulf %227, %178 : vector<2x32xf32>
    %cst_88 = arith.constant dense<0.000000e+00> : vector<2xf32>
    %229 = vector.multi_reduction <add>, %228, %cst_88 [1] : vector<2x32xf32> to vector<2xf32>
    %230 = vector.shape_cast %229 : vector<2xf32> to vector<2x1xf32>
    %231 = vector.extract_strided_slice %28 {offsets = [0, 416], sizes = [2, 32], strides = [1, 1]} : vector<2x1024xf32> to vector<2x32xf32>
    %232 = arith.mulf %231, %178 : vector<2x32xf32>
    %cst_89 = arith.constant dense<0.000000e+00> : vector<2xf32>
    %233 = vector.multi_reduction <add>, %232, %cst_89 [1] : vector<2x32xf32> to vector<2xf32>
    %234 = vector.shape_cast %233 : vector<2xf32> to vector<2x1xf32>
    %235 = vector.extract_strided_slice %28 {offsets = [0, 448], sizes = [2, 32], strides = [1, 1]} : vector<2x1024xf32> to vector<2x32xf32>
    %236 = arith.mulf %235, %178 : vector<2x32xf32>
    %cst_90 = arith.constant dense<0.000000e+00> : vector<2xf32>
    %237 = vector.multi_reduction <add>, %236, %cst_90 [1] : vector<2x32xf32> to vector<2xf32>
    %238 = vector.shape_cast %237 : vector<2xf32> to vector<2x1xf32>
    %239 = vector.extract_strided_slice %28 {offsets = [0, 480], sizes = [2, 32], strides = [1, 1]} : vector<2x1024xf32> to vector<2x32xf32>
    %240 = arith.mulf %239, %178 : vector<2x32xf32>
    %cst_91 = arith.constant dense<0.000000e+00> : vector<2xf32>
    %241 = vector.multi_reduction <add>, %240, %cst_91 [1] : vector<2x32xf32> to vector<2xf32>
    %242 = vector.shape_cast %241 : vector<2xf32> to vector<2x1xf32>
    %243 = vector.extract_strided_slice %28 {offsets = [0, 512], sizes = [2, 32], strides = [1, 1]} : vector<2x1024xf32> to vector<2x32xf32>
    %244 = arith.mulf %243, %178 : vector<2x32xf32>
    %cst_92 = arith.constant dense<0.000000e+00> : vector<2xf32>
    %245 = vector.multi_reduction <add>, %244, %cst_92 [1] : vector<2x32xf32> to vector<2xf32>
    %246 = vector.shape_cast %245 : vector<2xf32> to vector<2x1xf32>
    %247 = vector.extract_strided_slice %28 {offsets = [0, 544], sizes = [2, 32], strides = [1, 1]} : vector<2x1024xf32> to vector<2x32xf32>
    %248 = arith.mulf %247, %178 : vector<2x32xf32>
    %cst_93 = arith.constant dense<0.000000e+00> : vector<2xf32>
    %249 = vector.multi_reduction <add>, %248, %cst_93 [1] : vector<2x32xf32> to vector<2xf32>
    %250 = vector.shape_cast %249 : vector<2xf32> to vector<2x1xf32>
    %251 = vector.extract_strided_slice %28 {offsets = [0, 576], sizes = [2, 32], strides = [1, 1]} : vector<2x1024xf32> to vector<2x32xf32>
    %252 = arith.mulf %251, %178 : vector<2x32xf32>
    %cst_94 = arith.constant dense<0.000000e+00> : vector<2xf32>
    %253 = vector.multi_reduction <add>, %252, %cst_94 [1] : vector<2x32xf32> to vector<2xf32>
    %254 = vector.shape_cast %253 : vector<2xf32> to vector<2x1xf32>
    %255 = vector.extract_strided_slice %28 {offsets = [0, 608], sizes = [2, 32], strides = [1, 1]} : vector<2x1024xf32> to vector<2x32xf32>
    %256 = arith.mulf %255, %178 : vector<2x32xf32>
    %cst_95 = arith.constant dense<0.000000e+00> : vector<2xf32>
    %257 = vector.multi_reduction <add>, %256, %cst_95 [1] : vector<2x32xf32> to vector<2xf32>
    %258 = vector.shape_cast %257 : vector<2xf32> to vector<2x1xf32>
    %259 = vector.extract_strided_slice %28 {offsets = [0, 640], sizes = [2, 32], strides = [1, 1]} : vector<2x1024xf32> to vector<2x32xf32>
    %260 = arith.mulf %259, %178 : vector<2x32xf32>
    %cst_96 = arith.constant dense<0.000000e+00> : vector<2xf32>
    %261 = vector.multi_reduction <add>, %260, %cst_96 [1] : vector<2x32xf32> to vector<2xf32>
    %262 = vector.shape_cast %261 : vector<2xf32> to vector<2x1xf32>
    %263 = vector.extract_strided_slice %28 {offsets = [0, 672], sizes = [2, 32], strides = [1, 1]} : vector<2x1024xf32> to vector<2x32xf32>
    %264 = arith.mulf %263, %178 : vector<2x32xf32>
    %cst_97 = arith.constant dense<0.000000e+00> : vector<2xf32>
    %265 = vector.multi_reduction <add>, %264, %cst_97 [1] : vector<2x32xf32> to vector<2xf32>
    %266 = vector.shape_cast %265 : vector<2xf32> to vector<2x1xf32>
    %267 = vector.extract_strided_slice %28 {offsets = [0, 704], sizes = [2, 32], strides = [1, 1]} : vector<2x1024xf32> to vector<2x32xf32>
    %268 = arith.mulf %267, %178 : vector<2x32xf32>
    %cst_98 = arith.constant dense<0.000000e+00> : vector<2xf32>
    %269 = vector.multi_reduction <add>, %268, %cst_98 [1] : vector<2x32xf32> to vector<2xf32>
    %270 = vector.shape_cast %269 : vector<2xf32> to vector<2x1xf32>
    %271 = vector.extract_strided_slice %28 {offsets = [0, 736], sizes = [2, 32], strides = [1, 1]} : vector<2x1024xf32> to vector<2x32xf32>
    %272 = arith.mulf %271, %178 : vector<2x32xf32>
    %cst_99 = arith.constant dense<0.000000e+00> : vector<2xf32>
    %273 = vector.multi_reduction <add>, %272, %cst_99 [1] : vector<2x32xf32> to vector<2xf32>
    %274 = vector.shape_cast %273 : vector<2xf32> to vector<2x1xf32>
    %275 = vector.extract_strided_slice %28 {offsets = [0, 768], sizes = [2, 32], strides = [1, 1]} : vector<2x1024xf32> to vector<2x32xf32>
    %276 = arith.mulf %275, %178 : vector<2x32xf32>
    %cst_100 = arith.constant dense<0.000000e+00> : vector<2xf32>
    %277 = vector.multi_reduction <add>, %276, %cst_100 [1] : vector<2x32xf32> to vector<2xf32>
    %278 = vector.shape_cast %277 : vector<2xf32> to vector<2x1xf32>
    %279 = vector.extract_strided_slice %28 {offsets = [0, 800], sizes = [2, 32], strides = [1, 1]} : vector<2x1024xf32> to vector<2x32xf32>
    %280 = arith.mulf %279, %178 : vector<2x32xf32>
    %cst_101 = arith.constant dense<0.000000e+00> : vector<2xf32>
    %281 = vector.multi_reduction <add>, %280, %cst_101 [1] : vector<2x32xf32> to vector<2xf32>
    %282 = vector.shape_cast %281 : vector<2xf32> to vector<2x1xf32>
    %283 = vector.extract_strided_slice %28 {offsets = [0, 832], sizes = [2, 32], strides = [1, 1]} : vector<2x1024xf32> to vector<2x32xf32>
    %284 = arith.mulf %283, %178 : vector<2x32xf32>
    %cst_102 = arith.constant dense<0.000000e+00> : vector<2xf32>
    %285 = vector.multi_reduction <add>, %284, %cst_102 [1] : vector<2x32xf32> to vector<2xf32>
    %286 = vector.shape_cast %285 : vector<2xf32> to vector<2x1xf32>
    %287 = vector.extract_strided_slice %28 {offsets = [0, 864], sizes = [2, 32], strides = [1, 1]} : vector<2x1024xf32> to vector<2x32xf32>
    %288 = arith.mulf %287, %178 : vector<2x32xf32>
    %cst_103 = arith.constant dense<0.000000e+00> : vector<2xf32>
    %289 = vector.multi_reduction <add>, %288, %cst_103 [1] : vector<2x32xf32> to vector<2xf32>
    %290 = vector.shape_cast %289 : vector<2xf32> to vector<2x1xf32>
    %291 = vector.extract_strided_slice %28 {offsets = [0, 896], sizes = [2, 32], strides = [1, 1]} : vector<2x1024xf32> to vector<2x32xf32>
    %292 = arith.mulf %291, %178 : vector<2x32xf32>
    %cst_104 = arith.constant dense<0.000000e+00> : vector<2xf32>
    %293 = vector.multi_reduction <add>, %292, %cst_104 [1] : vector<2x32xf32> to vector<2xf32>
    %294 = vector.shape_cast %293 : vector<2xf32> to vector<2x1xf32>
    %295 = vector.extract_strided_slice %28 {offsets = [0, 928], sizes = [2, 32], strides = [1, 1]} : vector<2x1024xf32> to vector<2x32xf32>
    %296 = arith.mulf %295, %178 : vector<2x32xf32>
    %cst_105 = arith.constant dense<0.000000e+00> : vector<2xf32>
    %297 = vector.multi_reduction <add>, %296, %cst_105 [1] : vector<2x32xf32> to vector<2xf32>
    %298 = vector.shape_cast %297 : vector<2xf32> to vector<2x1xf32>
    %299 = vector.extract_strided_slice %28 {offsets = [0, 960], sizes = [2, 32], strides = [1, 1]} : vector<2x1024xf32> to vector<2x32xf32>
    %300 = arith.mulf %299, %178 : vector<2x32xf32>
    %cst_106 = arith.constant dense<0.000000e+00> : vector<2xf32>
    %301 = vector.multi_reduction <add>, %300, %cst_106 [1] : vector<2x32xf32> to vector<2xf32>
    %302 = vector.shape_cast %301 : vector<2xf32> to vector<2x1xf32>
    %303 = vector.extract_strided_slice %28 {offsets = [0, 992], sizes = [2, 32], strides = [1, 1]} : vector<2x1024xf32> to vector<2x32xf32>
    %304 = arith.mulf %303, %178 : vector<2x32xf32>
    %cst_107 = arith.constant dense<0.000000e+00> : vector<2xf32>
    %305 = vector.multi_reduction <add>, %304, %cst_107 [1] : vector<2x32xf32> to vector<2xf32>
    %306 = vector.shape_cast %305 : vector<2xf32> to vector<2x1xf32>
    %307 = tpu.concatenate %182, %186, %190, %194, %198, %202, %206, %210, %214, %218, %222, %226, %230, %234, %238, %242 in 1 : vector<2x1xf32>, vector<2x1xf32>, vector<2x1xf32>, vector<2x1xf32>, vector<2x1xf32>, vector<2x1xf32>, vector<2x1xf32>, vector<2x1xf32>, vector<2x1xf32>, vector<2x1xf32>, vector<2x1xf32>, vector<2x1xf32>, vector<2x1xf32>, vector<2x1xf32>, vector<2x1xf32>, vector<2x1xf32> -> vector<2x16xf32>
    %308 = tpu.concatenate %246, %250, %254, %258, %262, %266, %270, %274, %278, %282, %286, %290, %294, %298, %302, %306 in 1 : vector<2x1xf32>, vector<2x1xf32>, vector<2x1xf32>, vector<2x1xf32>, vector<2x1xf32>, vector<2x1xf32>, vector<2x1xf32>, vector<2x1xf32>, vector<2x1xf32>, vector<2x1xf32>, vector<2x1xf32>, vector<2x1xf32>, vector<2x1xf32>, vector<2x1xf32>, vector<2x1xf32>, vector<2x1xf32> -> vector<2x16xf32>
    %309 = tpu.concatenate %307, %308 in 1 : vector<2x16xf32>, vector<2x16xf32> -> vector<2x32xf32>
    %310 = arith.addf %309, %33 : vector<2x32xf32>
    %cst_108 = arith.constant 0.000000e+00 : f32
    %311 = vector.broadcast %cst_108 : f32 to vector<2x32xf32>
    %312 = arith.maximumf %310, %311 : vector<2x32xf32>
    %313 = vector.extract_strided_slice %38 {offsets = [0, 0], sizes = [2, 32], strides = [1, 1]} : vector<2x352xf32> to vector<2x32xf32>
    %314 = arith.mulf %313, %312 : vector<2x32xf32>
    %cst_109 = arith.constant dense<0.000000e+00> : vector<2xf32>
    %315 = vector.multi_reduction <add>, %314, %cst_109 [1] : vector<2x32xf32> to vector<2xf32>
    %316 = vector.shape_cast %315 : vector<2xf32> to vector<2x1xf32>
    %317 = vector.extract_strided_slice %38 {offsets = [0, 32], sizes = [2, 32], strides = [1, 1]} : vector<2x352xf32> to vector<2x32xf32>
    %318 = arith.mulf %317, %312 : vector<2x32xf32>
    %cst_110 = arith.constant dense<0.000000e+00> : vector<2xf32>
    %319 = vector.multi_reduction <add>, %318, %cst_110 [1] : vector<2x32xf32> to vector<2xf32>
    %320 = vector.shape_cast %319 : vector<2xf32> to vector<2x1xf32>
    %321 = vector.extract_strided_slice %38 {offsets = [0, 64], sizes = [2, 32], strides = [1, 1]} : vector<2x352xf32> to vector<2x32xf32>
    %322 = arith.mulf %321, %312 : vector<2x32xf32>
    %cst_111 = arith.constant dense<0.000000e+00> : vector<2xf32>
    %323 = vector.multi_reduction <add>, %322, %cst_111 [1] : vector<2x32xf32> to vector<2xf32>
    %324 = vector.shape_cast %323 : vector<2xf32> to vector<2x1xf32>
    %325 = vector.extract_strided_slice %38 {offsets = [0, 96], sizes = [2, 32], strides = [1, 1]} : vector<2x352xf32> to vector<2x32xf32>
    %326 = arith.mulf %325, %312 : vector<2x32xf32>
    %cst_112 = arith.constant dense<0.000000e+00> : vector<2xf32>
    %327 = vector.multi_reduction <add>, %326, %cst_112 [1] : vector<2x32xf32> to vector<2xf32>
    %328 = vector.shape_cast %327 : vector<2xf32> to vector<2x1xf32>
    %329 = vector.extract_strided_slice %38 {offsets = [0, 128], sizes = [2, 32], strides = [1, 1]} : vector<2x352xf32> to vector<2x32xf32>
    %330 = arith.mulf %329, %312 : vector<2x32xf32>
    %cst_113 = arith.constant dense<0.000000e+00> : vector<2xf32>
    %331 = vector.multi_reduction <add>, %330, %cst_113 [1] : vector<2x32xf32> to vector<2xf32>
    %332 = vector.shape_cast %331 : vector<2xf32> to vector<2x1xf32>
    %333 = vector.extract_strided_slice %38 {offsets = [0, 160], sizes = [2, 32], strides = [1, 1]} : vector<2x352xf32> to vector<2x32xf32>
    %334 = arith.mulf %333, %312 : vector<2x32xf32>
    %cst_114 = arith.constant dense<0.000000e+00> : vector<2xf32>
    %335 = vector.multi_reduction <add>, %334, %cst_114 [1] : vector<2x32xf32> to vector<2xf32>
    %336 = vector.shape_cast %335 : vector<2xf32> to vector<2x1xf32>
    %337 = vector.extract_strided_slice %38 {offsets = [0, 192], sizes = [2, 32], strides = [1, 1]} : vector<2x352xf32> to vector<2x32xf32>
    %338 = arith.mulf %337, %312 : vector<2x32xf32>
    %cst_115 = arith.constant dense<0.000000e+00> : vector<2xf32>
    %339 = vector.multi_reduction <add>, %338, %cst_115 [1] : vector<2x32xf32> to vector<2xf32>
    %340 = vector.shape_cast %339 : vector<2xf32> to vector<2x1xf32>
    %341 = vector.extract_strided_slice %38 {offsets = [0, 224], sizes = [2, 32], strides = [1, 1]} : vector<2x352xf32> to vector<2x32xf32>
    %342 = arith.mulf %341, %312 : vector<2x32xf32>
    %cst_116 = arith.constant dense<0.000000e+00> : vector<2xf32>
    %343 = vector.multi_reduction <add>, %342, %cst_116 [1] : vector<2x32xf32> to vector<2xf32>
    %344 = vector.shape_cast %343 : vector<2xf32> to vector<2x1xf32>
    %345 = vector.extract_strided_slice %38 {offsets = [0, 256], sizes = [2, 32], strides = [1, 1]} : vector<2x352xf32> to vector<2x32xf32>
    %346 = arith.mulf %345, %312 : vector<2x32xf32>
    %cst_117 = arith.constant dense<0.000000e+00> : vector<2xf32>
    %347 = vector.multi_reduction <add>, %346, %cst_117 [1] : vector<2x32xf32> to vector<2xf32>
    %348 = vector.shape_cast %347 : vector<2xf32> to vector<2x1xf32>
    %349 = vector.extract_strided_slice %38 {offsets = [0, 288], sizes = [2, 32], strides = [1, 1]} : vector<2x352xf32> to vector<2x32xf32>
    %350 = arith.mulf %349, %312 : vector<2x32xf32>
    %cst_118 = arith.constant dense<0.000000e+00> : vector<2xf32>
    %351 = vector.multi_reduction <add>, %350, %cst_118 [1] : vector<2x32xf32> to vector<2xf32>
    %352 = vector.shape_cast %351 : vector<2xf32> to vector<2x1xf32>
    %353 = vector.extract_strided_slice %38 {offsets = [0, 320], sizes = [2, 32], strides = [1, 1]} : vector<2x352xf32> to vector<2x32xf32>
    %354 = arith.mulf %353, %312 : vector<2x32xf32>
    %cst_119 = arith.constant dense<0.000000e+00> : vector<2xf32>
    %355 = vector.multi_reduction <add>, %354, %cst_119 [1] : vector<2x32xf32> to vector<2xf32>
    %356 = vector.shape_cast %355 : vector<2xf32> to vector<2x1xf32>
    %357 = tpu.concatenate %316, %320, %324, %328, %332, %336, %340, %344, %348, %352, %356 in 1 : vector<2x1xf32>, vector<2x1xf32>, vector<2x1xf32>, vector<2x1xf32>, vector<2x1xf32>, vector<2x1xf32>, vector<2x1xf32>, vector<2x1xf32>, vector<2x1xf32>, vector<2x1xf32>, vector<2x1xf32> -> vector<2x11xf32>
    %358 = arith.addf %357, %43 : vector<2x11xf32>
    %c0_120 = arith.constant 0 : index
    %c0_121 = arith.constant 0 : index
    %359 = vector.load %arg18[%c0_120, %c0_121] : memref<2x11xf32, #tpu.memory_space<vmem>>, vector<2x11xf32>
    tpu.vector_store %arg18[%c0_120, %c0_121], %358 {strides = array<i32>} : memref<2x11xf32, #tpu.memory_space<vmem>>, vector<2x11xf32>,
    return
  }
}

</mosaic_0001>

<bundles_post_ra>
// kernel: actor_forward.1
= control target key start
LH: loop header
LB: loop body
LE: loop exit
PB: predicated region body
PF: predicated region fallthrough
CT: control target
= control target key end

     0   :  { %s3826_s0 = inlined_call_operand.vmem [shape: f32[2,32], index: 0, kind: input, shape index: {}]   ;;  %s3827_s1 = inlined_call_operand.vmem [shape: f32[2,56], index: 1, kind: input, shape index: {}]   ;;  %s3828_s2 = inlined_call_operand.vmem [shape: f32[32,32], index: 2, kind: input, shape index: {}]   ;;  %s3829_s3 = inlined_call_operand.hbm [shape: f32[1,32], index: 3, kind: input, shape index: {}]   ;;  %s3830_s4 = inlined_call_operand.hbm [shape: f32[32,32], index: 4, kind: input, shape index: {}]   ;;  %s3831_s5 = inlined_call_operand.hbm [shape: f32[1,32], index: 5, kind: input, shape index: {}]   ;;  %s3832_s6 = inlined_call_operand.vmem [shape: bf16[32,1792], index: 6, kind: input, shape index: {}]   ;;  %s3833_s7 = inlined_call_operand.hbm [shape: f32[1,1792], index: 7, kind: input, shape index: {}]   ;;  %s3834_s8 = inlined_call_operand.vmem [shape: bf16[32,32], index: 8, kind: input, shape index: {}]   ;;  %s3835_s9 = inlined_call_operand.hbm [shape: f32[1,32], index: 9, kind: input, shape index: {}]   ;;  %s3836_s10 = inlined_call_operand.hbm [shape: bf16[32,1024], index: 10, kind: input, shape index: {}]   ;;  %s3837_s11 = inlined_call_operand.hbm [shape: f32[1,1024], index: 11, kind: input, shape index: {}]   ;;  %s3838_s12 = inlined_call_operand.hbm [shape: bf16[32,32], index: 12, kind: input, shape index: {}]   ;;  %s3839_s13 = inlined_call_operand.hbm [shape: f32[1,32], index: 13, kind: input, shape index: {}]   ;;  %s3840_s14 = inlined_call_operand.vmem [shape: bf16[32,352], index: 14, kind: input, shape index: {}]   ;;  %s3841_s15 = inlined_call_operand.hbm [shape: f32[1,352], index: 15, kind: input, shape index: {}]   ;;  %s3842_s16 = inlined_call_operand.vmem [shape: bf16[32,11], index: 16, kind: input, shape index: {}]   ;;  %s3843_s17 = inlined_call_operand.hbm [shape: f32[1,11], index: 17, kind: input, shape index: {}]   ;;  %s3844_s18 = inlined_call_operand.hbm [shape: f32[2,11], index: 18, kind: output, shape index: {}]  }
   0x1   :  { %3848 = sst [smem:[#allocation28_spill]] %s3826_s0 }
   0x2   :  { %3849 = sst [smem:[#allocation29_spill]] %s3827_s1 }
   0x3   :  { %3850 = sst [smem:[#allocation30_spill]] %s3828_s2 }
   0x4   :  { %23 = vsyncpa [#allocation3], 0 }
   0x5   :  { %24 = vsyncpa [#allocation6], 0 }
   0x6   :  { %25 = vsyncpa [#allocation9], 0 }
   0x7   :  { %26 = vsyncpa [#allocation12], 0 }
   0x8   :  { %27 = vsyncpa [#allocation15], 0 }
   0x9   :  { %28 = vsyncpa [#allocation18], 0 }
   0xa   :  { %29 = vsyncpa [#allocation4], 0  ;;  %s2829_s27 = smov [#allocation5]  }
   0xb   :  { %s51_s28 = sshll.u32 %s2829_s27, 4  ;;  %s52_s28 = int_to_ptr.vmem [resolvable:$true] %s51_s28 }
   0xc   :  { %s2583_s29 = scalar_lea.vmem %s52_s28, 512  ;;  %p2588_p1 = scmp.lt.s32.totalorder %s52_s28, %s52_s28 }
   0xd   :  { %p2584_p0 = scmp.ne.s32.totalorder %s52_s28, %s2583_s29  ;;  %p2589_p2 = scmp.lt.s32.totalorder %s2583_s29, %s2583_s29 }
   0xf   :  { %p2590_p3 = por %p2589_p2, %p2588_p1 }
  0x11   :  { %p2591_p4 = pnand %p2590_p3, %p2584_p0 }
  0x13   :  { %2594 = shalt.err (!%p2591_p4)
}
  0x14   :  { %s2830_s30 = smov 128   ;;  %s2831_s0 = smov 8  }
  0x15   :  { %57 = dma.hbm_to_vmem [thread:$0]  %s3830_s4, 512, %s52_s28, [#allocation6], %s2830_s30, %s2830_s30, %s2831_s0  }
  0x16   :  { %s2832_s20 = smov [#allocation8]   ;;  %s2833_s22 = smov [#allocation11]  }
  0x17   :  { %s76_s21 = sshll.u32 %s2832_s20, 4  ;;  %s97_s2 = sshll.u32 %s2833_s22, 4  ;;  %s77_s21 = int_to_ptr.vmem [resolvable:$true] %s76_s21  ;;  %s98_s2 = int_to_ptr.vmem [resolvable:$true] %s97_s2 }
  0x18   :  { %s2603_s23 = scalar_lea.vmem %s77_s21, 224  ;;  %p2608_p6 = scmp.lt.s32.totalorder %s77_s21, %s77_s21 }
  0x19   :  { %p2604_p5 = scmp.ne.s32.totalorder %s77_s21, %s2603_s23  ;;  %p2609_p7 = scmp.lt.s32.totalorder %s2603_s23, %s2603_s23 }
  0x1b   :  { %p2610_p8 = por %p2609_p7, %p2608_p6 }
  0x1d   :  { %p2611_p9 = pnand %p2610_p8, %p2604_p5 }
  0x1f   :  { %2614 = shalt.err (!%p2611_p9)
}
  0x20   :  { %79 = dma.hbm_to_vmem [thread:$0]  %s3833_s7, 224, %s77_s21, [#allocation9]  }
  0x21   :  { %s2623_s26 = scalar_lea.vmem %s98_s2, 2048  ;;  %p2628_p11 = scmp.lt.s32.totalorder %s98_s2, %s98_s2 }
  0x22   :  { %p2624_p10 = scmp.ne.s32.totalorder %s98_s2, %s2623_s26  ;;  %p2629_p12 = scmp.lt.s32.totalorder %s2623_s26, %s2623_s26 }
  0x24   :  { %p2630_p13 = por %p2629_p12, %p2628_p11 }
  0x26   :  { %p2631_p0 = pnand %p2630_p13, %p2624_p10 }
  0x28   :  { %2634 = shalt.err (!%p2631_p0)
}
  0x29   :  { %s2834_s4 = smov 512   ;;  %s2835_s27 = smov 32  }
  0x2a   :  { %103 = dma.hbm_to_vmem [thread:$0]  %s3836_s10, 2048, %s98_s2, [#allocation12], %s2834_s4, %s2834_s4, %s2835_s27  }
  0x2b   :  { %s2836_s30 = smov [#allocation14]  }
  0x2c   :  { %s119_s19 = sshll.u32 %s2836_s30, 4  ;;  %s120_s19 = int_to_ptr.vmem [resolvable:$true] %s119_s19 }
  0x2d   :  { %s2643_s1 = scalar_lea.vmem %s120_s19, 256  ;;  %p2648_p2 = scmp.lt.s32.totalorder %s120_s19, %s120_s19 }
  0x2e   :  { %p2644_p1 = scmp.ne.s32.totalorder %s120_s19, %s2643_s1  ;;  %p2649_p3 = scmp.lt.s32.totalorder %s2643_s1, %s2643_s1 }
  0x30   :  { %p2650_p4 = por %p2649_p3, %p2648_p2 }
  0x32   :  { %p2651_p5 = pnand %p2650_p4, %p2644_p1 }
  0x34   :  { %2654 = shalt.err (!%p2651_p5)
}
  0x35   :  { %s2837_s7 = smov 64   ;;  %s2838_s20 = smov 4  }
  0x36   :  { %125 = dma.hbm_to_vmem [thread:$0]  %s3838_s12, 256, %s120_s19, [#allocation15], %s2837_s7, %s2837_s7, %s2838_s20  }
  0x37   :  { %s2839_s23 = smov [#allocation17]   ;;  %s2840_s2 = smov [#allocation2]  }
  0x38   :  { %s144_s10 = sshll.u32 %s2839_s23, 4  ;;  %s42_s24 = sshll.u32 %s2840_s2, 4  ;;  %s145_s10 = int_to_ptr.vmem [resolvable:$true] %s144_s10  ;;  %s43_s24 = int_to_ptr.vmem [resolvable:$true] %s42_s24 }
  0x39   :  { %s2663_s25 = scalar_lea.vmem %s145_s10, 48  ;;  %s2667_s26 = scalar_lea.vmem %s145_s10, 64 }
  0x3a   :  { %p2664_p6 = scmp.ne.s32.totalorder %s145_s10, %s2663_s25  ;;  %p2668_p7 = scmp.lt.s32.totalorder %s145_s10, %s145_s10 }
  0x3b   :  { %p2669_p8 = scmp.lt.s32.totalorder %s2667_s26, %s2663_s25 }
  0x3d   :  { %p2670_p9 = por %p2669_p8, %p2668_p7 }
  0x3f   :  { %p2671_p10 = pnand %p2670_p9, %p2664_p6 }
  0x41   :  { %2674 = shalt.err (!%p2671_p10)
}
  0x42   :  { %147 = dma.hbm_to_vmem [thread:$0]  %s3841_s15, 48, %s145_s10, [#allocation18]  }
  0x43   :  { %s2683_s29 = scalar_lea.vmem %s43_s24, 16  ;;  %s2687_s12 = scalar_lea.vmem %s43_s24, 32 }
  0x44   :  { %p2684_p11 = scmp.ne.s32.totalorder %s43_s24, %s2683_s29  ;;  %p2688_p12 = scmp.lt.s32.totalorder %s43_s24, %s43_s24 }
  0x45   :  { %p2689_p13 = scmp.lt.s32.totalorder %s2687_s12, %s2683_s29 }
  0x47   :  { %p2690_p0 = por %p2689_p13, %p2688_p12 }
  0x49   :  { %p2691_p1 = pnand %p2690_p0, %p2684_p11 }
  0x4b   :  { %2694 = shalt.err (!%p2691_p1)
}
  0x4c   :  { %45 = dma.hbm_to_vmem [thread:$0]  %s3829_s3, 16, %s43_s24, [#allocation3]  }
  0x4d   :  { %s2841_s1 = smov [#allocation7]   ;;  %s2842_s21 = smov [#allocation10]  }
  0x4e   :  { %s64_s20 = sshll.u32 %s2841_s1, 4  ;;  %s88_s22 = sshll.u32 %s2842_s21, 4  ;;  %s65_s20 = int_to_ptr.vmem [resolvable:$true] %s64_s20  ;;  %s89_s22 = int_to_ptr.vmem [resolvable:$true] %s88_s22 }
  0x4f   :  { %s2703_s23 = scalar_lea.vmem %s65_s20, 16  ;;  %s2707_s15 = scalar_lea.vmem %s65_s20, 32 }
  0x50   :  { %p2704_p2 = scmp.ne.s32.totalorder %s65_s20, %s2703_s23  ;;  %p2708_p3 = scmp.lt.s32.totalorder %s65_s20, %s65_s20 }
  0x51   :  { %p2709_p4 = scmp.lt.s32.totalorder %s2707_s15, %s2703_s23 }
  0x53   :  { %p2710_p5 = por %p2709_p4, %p2708_p3 }
  0x55   :  { %p2711_p6 = pnand %p2710_p5, %p2704_p2 }
  0x57   :  { %2714 = shalt.err (!%p2711_p6)
}
  0x58   :  { %67 = dma.hbm_to_vmem [thread:$0]  %s3831_s5, 16, %s65_s20, [#allocation6]  }
  0x59   :  { %s2723_s25 = scalar_lea.vmem %s89_s22, 16  ;;  %s2727_s3 = scalar_lea.vmem %s89_s22, 32 }
  0x5a   :  { %p2724_p7 = scmp.ne.s32.totalorder %s89_s22, %s2723_s25  ;;  %p2728_p8 = scmp.lt.s32.totalorder %s89_s22, %s89_s22 }
  0x5b   :  { %p2729_p9 = scmp.lt.s32.totalorder %s2727_s3, %s2723_s25 }
  0x5d   :  { %p2730_p10 = por %p2729_p9, %p2728_p8 }
  0x5f   :  { %p2731_p11 = pnand %p2730_p10, %p2724_p7 }
  0x61   :  { %2734 = shalt.err (!%p2731_p11)
}
  0x62   :  { %91 = dma.hbm_to_vmem [thread:$0]  %s3835_s9, 16, %s89_s22, [#allocation9]  }
  0x63   :  { %s2843_s4 = smov [#allocation13]   ;;  %s2844_s29 = smov [#allocation16]  }
  0x64   :  { %s110_s28 = sshll.u32 %s2843_s4, 4  ;;  %s132_s12 = sshll.u32 %s2844_s29, 4  ;;  %s111_s28 = int_to_ptr.vmem [resolvable:$true] %s110_s28  ;;  %s133_s12 = int_to_ptr.vmem [resolvable:$true] %s132_s12 }
  0x65   :  { %s2743_s30 = scalar_lea.vmem %s111_s28, 128  ;;  %p2748_p13 = scmp.lt.s32.totalorder %s111_s28, %s111_s28 }
  0x66   :  { %p2744_p12 = scmp.ne.s32.totalorder %s111_s28, %s2743_s30  ;;  %p2749_p0 = scmp.lt.s32.totalorder %s2743_s30, %s2743_s30 }
  0x68   :  { %p2750_p1 = por %p2749_p0, %p2748_p13 }
  0x6a   :  { %p2751_p2 = pnand %p2750_p1, %p2744_p12 }
  0x6c   :  { %2754 = shalt.err (!%p2751_p2)
}
  0x6d   :  { %113 = dma.hbm_to_vmem [thread:$0]  %s3837_s11, 128, %s111_s28, [#allocation12]  }
  0x6e   :  { %s2763_s1 = scalar_lea.vmem %s133_s12, 16  ;;  %s2767_s9 = scalar_lea.vmem %s133_s12, 32 }
  0x6f   :  { %p2764_p3 = scmp.ne.s32.totalorder %s133_s12, %s2763_s1  ;;  %p2768_p4 = scmp.lt.s32.totalorder %s133_s12, %s133_s12 }
  0x70   :  { %p2769_p5 = scmp.lt.s32.totalorder %s2767_s9, %s2763_s1 }
  0x72   :  { %p2770_p6 = por %p2769_p5, %p2768_p4 }
  0x74   :  { %p2771_p7 = pnand %p2770_p6, %p2764_p3 }
  0x76   :  { %2774 = shalt.err (!%p2771_p7)
}
  0x77   :  { %135 = dma.hbm_to_vmem [thread:$0]  %s3839_s13, 16, %s133_s12, [#allocation15]  }
  0x78   :  { %s2845_s22 = smov [#allocation19]  }
  0x79   :  { %s156_s23 = sshll.u32 %s2845_s22, 4  ;;  %s157_s23 = int_to_ptr.vmem [resolvable:$true] %s156_s23 }
  0x7a   :  { %s2783_s15 = scalar_lea.vmem %s157_s23, 16  ;;  %s2787_s10 = scalar_lea.vmem %s157_s23, 32 }
  0x7b   :  { %p2784_p8 = scmp.ne.s32.totalorder %s157_s23, %s2783_s15  ;;  %p2788_p9 = scmp.lt.s32.totalorder %s157_s23, %s157_s23 }
  0x7c   :  { %p2789_p10 = scmp.lt.s32.totalorder %s2787_s10, %s2783_s15 }
  0x7e   :  { %p2790_p11 = por %p2789_p10, %p2788_p9 }
  0x80   :  { %p2791_p12 = pnand %p2790_p11, %p2784_p8 }
  0x82   :  { %2794 = shalt.err (!%p2791_p12)
}
  0x83   :  { %159 = dma.hbm_to_vmem [thread:$0]  %s3843_s17, 16, %s157_s23, [#allocation18]  }
  0x84   :  { %2815 = dma.done.wait [#allocation3], 16  }
  0x85   :  { %2816 = vsyncadd [#allocation3], 4294967280 }
  0x86   :  { %2817 = dma.done.wait [#allocation6], 528  }
  0x87   :  { %2818 = vsyncadd [#allocation6], 4294966768 }
  0x88   :  { %2819 = dma.done.wait [#allocation9], 240  }
  0x89   :  { %2820 = vsyncadd [#allocation9], 4294967056 }
  0x8a   :  { %2821 = dma.done.wait [#allocation12], 2176  }
  0x8b   :  { %2822 = vsyncadd [#allocation12], 4294965120 }
  0x8c   :  { %2823 = dma.done.wait [#allocation15], 272  }
  0x8d   :  { %2824 = vsyncadd [#allocation15], 4294967024 }
  0x8e   :  { %2825 = dma.done.wait [#allocation18], 64  }
  0x8f   :  { %2826 = vsyncadd [#allocation18], 4294967232  ;;  %v2846_v0 = vmov 0.0   ;;  %vm2847_vm0 = vmmov 0   ;;  %s3851_s25 = sld [smem:[#allocation30_spill]]  ;;  %v284_v4 = vld [vmem:[#allocation5 + $0x18] sm:$0xff] }
  0x90   :  { %2431 = vmatprep.subr.mxu0 %v2846_v0  ;;  %2439 = vmatprep.mubr.msk.f32.mxu0 %vm2847_vm0, %v2846_v0  ;;  %s3852_s5 = sld [smem:[#allocation28_spill]]  ;;  %vm206_vm1 = vcmask 261120   ;;  %v283_v7 = vld [vmem:[#allocation5 + $0x10] sm:$0xff]  ;;  %v282_v8 = vld [vmem:[#allocation5 + $0x8] sm:$0xff]  ;;  %v281_v9 = vld [vmem:[#allocation5] sm:$0xff]  ;;  %v2848_v25 = vmov 0  }
  0x91   :  { %2442 = vmatprep.subr.mxu1 %v2846_v0  ;;  %2450 = vmatprep.mubr.msk.f32.mxu1 %vm2847_vm0, %v2846_v0  ;;  %v2518_v10 = vld [vmem:[%s3832_s6 + $0x70] ss:$56 sps:$4 sm:$0xff]   ;;  %v2520_v11 = vld [vmem:[%s3832_s6 + $0x74] ss:$56 sps:$4 sm:$0xff]   ;;  %v2330_v13 = vld [vmem:[#allocation2] ss:$0 sm:$0xff] }
  0x92   :  { %2443 = vmatpush3.msra.mxu1 %v284_v4  ;;  %v2523_v12 = vld [vmem:[%s3832_s6 + $0x7c] ss:$56 sps:$4 sm:$0xff]   ;;  %v2521_v17 = vld [vmem:[%s3832_s6 + $0x78] ss:$56 sps:$4 sm:$0xff]   ;;  %v2529_v20 = vld [vmem:[%s3832_s6 + $0xc] ss:$56 sps:$4 sm:$0xff]  }
  0x93   :  { %2444 = vmatprep.subr.mxu1 %v2846_v0  ;;  %v2526_v19 = vld [vmem:[%s3832_s6 + $0x4] ss:$56 sps:$4 sm:$0xff]   ;;  %v2524_v21 = vld [vmem:[%s3832_s6] ss:$56 sps:$4 sm:$0xff]   ;;  %s2849_s19 = smov 56   ;;  %s2850_s1 = smov 112  }
  0x94   :  { %2445 = vmatpush3.msra.mxu1 %v283_v7  ;;  %v2527_v22 = vld [vmem:[%s3832_s6 + $0x8] ss:$56 sps:$4 sm:$0xff]   ;;  %v2532_v23 = vld [vmem:[%s3832_s6 + $0x84] ss:$56 sps:$4 sm:$0xff]   ;;  %s2851_s9 = smov 40   ;;  %s2852_s20 = smov 96  }
  0x95   :  { %v198_v1 = vld [vmem:[%s3851_s25 + $0x18] sm:$0xff]  ;;  %v197_v2 = vld [vmem:[%s3851_s25 + $0x10] sm:$0xff]  ;;  %v196_v3 = vld [vmem:[%s3851_s25 + $0x8] sm:$0xff]  ;;  %2446 = vmatprep.subr.mxu1 %v2846_v0  ;;  %s2853_s21 = smov 80   ;;  %s2854_s22 = smov 24   ;;  %vm1529_vm2 = vcmask 451584  }
  0x96   :  { %2432 = vmatpush3.msra.mxu0 %v198_v1  ;;  %v195_v5 = vld [vmem:[%s3851_s25] sm:$0xff]  ;;  %2447 = vmatpush3.msra.mxu1 %v282_v8  ;;  %s2855_s23 = smov 48   ;;  %s2856_s15 = smov 120   ;;  %v2538_v34 = vld [vmem:[%s3832_s6 + $0x14] ss:$56 sps:$4 sm:$0xff]   ;;  %vm1611_vm3 = vcmask 392192  }
  0x97   :  { %2433 = vmatprep.subr.mxu0 %v2846_v0  ;;  %v194_v6 = vld [vmem:[%s3852_s5] sm:$0x3]  ;;  %2448 = vmatprep.subr.mxu1 %v2846_v0  ;;  %v2535_v24 = vld [vmem:[%s3832_s6 + $0x8c] ss:$56 sps:$4 sm:$0xff]   ;;  %s3853_s5 = sld [smem:[#allocation29_spill]]  ;;  %s2857_s10 = smov 88  }
  0x98   :  { %2434 = vmatpush3.msra.mxu0 %v197_v2  ;;  %2449 = vmatpush3.msra.mxu1 %v281_v9  ;;  %s2858_s11 = smov 104   ;;  %s2859_s2 = smov 72   ;;  %v2332_v27 = vld [vmem:[#allocation7] ss:$0 sm:$0xff]  ;;  %v2541_v35 = vld [vmem:[%s3832_s6 + $0x1c] ss:$56 sps:$4 sm:$0xff]  }
  0x99   :  { %2435 = vmatprep.subr.mxu0 %v2846_v0  ;;  %664 = vmatprep.subr.bf16.mxu1 %v2523_v12  ;;  %s2860_s13 = smov 16   ;;  %v2530_v31 = vld [vmem:[%s3832_s6 + $0x80] ss:$56 sps:$4 sm:$0xff]   ;;  %v2536_v36 = vld [vmem:[%s3832_s6 + $0x10] ss:$56 sps:$4 sm:$0xff]   ;;  %vm1678_vm4 = vcmask 195584  }
  0x9a   :  { %2436 = vmatpush3.msra.mxu0 %v196_v3  ;;  %v2533_v32 = vld [vmem:[%s3832_s6 + $0x88] ss:$56 sps:$4 sm:$0xff]   ;;  %v2539_v37 = vld [vmem:[%s3832_s6 + $0x18] ss:$56 sps:$4 sm:$0xff]   ;;  %v2544_v38 = vld [vmem:[%s3832_s6 + $0x94] ss:$56 sps:$4 sm:$0xff]  }
  0x9b   :  { %2437 = vmatprep.subr.mxu0 %v2846_v0  ;;  %v2547_v39 = vld [vmem:[%s3832_s6 + $0x9c] ss:$56 sps:$4 sm:$0xff]   ;;  %v2542_v40 = vld [vmem:[%s3832_s6 + $0x90] ss:$56 sps:$4 sm:$0xff]   ;;  %v2553_v43 = vld [vmem:[%s3832_s6 + $0x2c] ss:$56 sps:$4 sm:$0xff]  }
  0x9c   :  { %2438 = vmatpush3.msra.mxu0 %v195_v5  ;;  %v2545_v41 = vld [vmem:[%s3832_s6 + $0x98] ss:$56 sps:$4 sm:$0xff]   ;;  %v2550_v42 = vld [vmem:[%s3832_s6 + $0x24] ss:$56 sps:$4 sm:$0xff]   ;;  %v2551_v45 = vld [vmem:[%s3832_s6 + $0x28] ss:$56 sps:$4 sm:$0xff]  }
  0x9d   :  { %2440 = vmatmul.mubr.msk.f32.vlgmr.msra.gmra.mxu0 %vm206_vm1, %v194_v6  ;;  %623 = vmatprep.subr.bf16.mxu0 %v2520_v11  ;;  %v3058_v26 = vld [vmem:[%s3853_s5] sm:$0x3]  ;;  %v2556_v46 = vld [vmem:[%s3832_s6 + $0xa4] ss:$56 sps:$4 sm:$0xff]   ;;  %v2557_v48 = vld [vmem:[%s3834_s8 + $0x8] sm:$0xff]   ;;  %vm1706_vm5 = vcmask 326656  }
  0x9e   :  { %624 = vmatpush1.bf16.msra.mxu0 %v2518_v10  ;;  %643 = vmatprep.mubr.bf16.mxu0 %v2848_v25  ;;  %v2548_v44 = vld [vmem:[%s3832_s6 + $0x20] ss:$56 sps:$4 sm:$0xff]   ;;  %v2560_v49 = vld [vmem:[%s3832_s6 + $0x34] ss:$56 sps:$4 sm:$0xff]   ;;  %v2558_v54 = vld [vmem:[%s3832_s6 + $0x30] ss:$56 sps:$4 sm:$0xff]  }
  0x9f   :  { %625 = vmatprep.subr.bf16.mxu0 %v2526_v19  ;;  %1534 = vrot.lane.b32.xlu0 %v3058_v26, %s2849_s19  ;;  %v2554_v47 = vld [vmem:[%s3832_s6 + $0xa0] ss:$56 sps:$4 sm:$0xff]   ;;  %v971_v3 = vld [vmem:[#allocation11 + $0x50] sm:$0xff]  ;;  %v972_v5 = vld [vmem:[#allocation11 + $0x58] sm:$0xff]  ;;  %vm3846_vm6 = vcmask 130048   ;;  %vm1650_vm7 = vcmask 64512  }
  0xa0   :  { %1562 = vrot.lane.b32.xlu1 %v3058_v26, %s2851_s9  ;;  %v969_v50 = vld [vmem:[#allocation11 + $0x40] sm:$0xff]  ;;  %v970_v52 = vld [vmem:[#allocation11 + $0x48] sm:$0xff]  ;;  %v975_v4 = vld [vmem:[#allocation11 + $0x70] sm:$0xff]  ;;  %vm1888_vm8 = vcmask 7168   ;;  %vm1890_vm9 = vcmask 15360   ;;  %vm1892_vm10 = vcmask 23552  }
  0xa1   :  { %v973_v51 = vld [vmem:[#allocation11 + $0x60] sm:$0xff]  ;;  %v974_v53 = vld [vmem:[#allocation11 + $0x68] sm:$0xff]  ;;  %v976_v6 = vld [vmem:[#allocation11 + $0x78] sm:$0xff]  ;;  %v2386_v9 = vcombine.high %v971_v3, %v975_v4  ;;  %vm1894_vm11 = vcmask 31744   ;;  %vm1896_vm12 = vcmask 39936   ;;  %vm1898_vm13 = vcmask 48128  }
  0xa2   :  { %626 = vmatpush1.bf16.msra.mxu0 %v2524_v21  ;;  %v2561_v55 = vld [vmem:[%s3834_s8] sm:$0xff]   ;;  %v2382_v56 = vcombine.high %v969_v50, %v973_v51  ;;  %v2384_v57 = vcombine.high %v970_v52, %v974_v53  ;;  %v961_v58 = vld [vmem:[#allocation11] sm:$0xff]  ;;  %v2381_v62 = vcombine.low %v969_v50, %v973_v51  ;;  %v2383_v63 = vcombine.low %v970_v52, %v974_v53  ;;  %v2564_v21 = vld [vmem:[%s3840_s14 + $0x1c] ss:$12 sps:$4 sm:$0xff]  }
  0xa3   :  { %705 = vmatprep.subr.bf16.mxu0 %v2532_v23  ;;  %1545 = vrot.lane.b32.xlu0 %v3058_v26, %s2850_s1  ;;  %v965_v59 = vld [vmem:[#allocation11 + $0x20] sm:$0xff]  ;;  %v962_v60 = vld [vmem:[#allocation11 + $0x8] sm:$0xff]  ;;  %v2388_v10 = vcombine.high %v972_v5, %v976_v6  ;;  %v963_v11 = vld [vmem:[#allocation11 + $0x10] sm:$0xff]  ;;  %vm1900_vm14 = vcmask 56320   ;;  %vm1903_vm15 = vcmask 72704  }
  0xa4   :  { %1600 = vrot.lane.b32.xlu1 %v3058_v26, %s2853_s21  ;;  %v966_v61 = vld [vmem:[#allocation11 + $0x28] sm:$0xff]  ;;  %v2374_v1 = vcombine.high %v961_v58, %v965_v59  ;;  %v2373_v7 = vcombine.low %v961_v58, %v965_v59  ;;  %v967_v12 = vld [vmem:[#allocation11 + $0x30] sm:$0xff] }
  0xa5   :  { %v2376_v2 = vcombine.high %v962_v60, %v966_v61  ;;  %v2375_v8 = vcombine.low %v962_v60, %v966_v61  ;;  %v2377_v19 = vcombine.low %v963_v11, %v967_v12  ;;  %v2565_v23 = vld [vmem:[#allocation14 + $0x8] sm:$0xff]  }
  0xa7   :  { %1573 = vrot.lane.b32.xlu0 %v3058_v26, %s2852_s20 }
  0xa8   :  { %1628 = vrot.lane.b32.xlu1 %v3058_v26, %s2837_s7 }
  0xab   :  { %1589 = vrot.lane.b32.xlu0 %v3058_v26, %s2854_s22 }
  0xac   :  { %1656 = vrot.lane.b32.xlu1 %v3058_v26, %s2855_s23 }
  0xaf   :  { %1617 = vrot.lane.b32.xlu0 %v3058_v26, %s2831_s0 }
  0xb0   :  { %1695 = vrot.lane.b32.xlu1 %v3058_v26, %s2857_s10 }
  0xb3   :  { %1639 = vrot.lane.b32.xlu0 %v3058_v26, %s2856_s15 }
  0xb4   :  { %1723 = vrot.lane.b32.xlu1 %v3058_v26, %s2859_s2 }
  0xb7   :  { %1667 = vrot.lane.b32.xlu0 %v3058_v26, %s2858_s11 }
  0xbb   :  { %1684 = vrot.lane.b32.xlu0 %v3058_v26, %s2835_s27 }
  0xbf   :  { %1712 = vrot.lane.b32.xlu0 %v3058_v26, %s2860_s13 }
 0x15d   :  { %v276_v14 = vpop.f32.mrf.mxu0 }
 0x15e   :  { %v277_v15 = vadd.f32 %v2330_v13, %v276_v14  ;;  %v964_v13 = vld [vmem:[#allocation11 + $0x18] sm:$0xff] }
 0x15f   :  { %v2441_v16 = vpop.f32.mrf.mxu0  ;;  %v968_v14 = vld [vmem:[#allocation11 + $0x38] sm:$0xff] }
 0x160   :  { %v280_v18 = vmax.f32 %v277_v15, 0.0  ;;  %v2385_v15 = vcombine.low %v971_v3, %v975_v4  ;;  %v2387_v16 = vcombine.low %v972_v5, %v976_v6 }
 0x162   :  { %2451 = vmatmul.mubr.msk.f32.vlgmr.msra.gmra.mxu1 %vm206_vm1, %v280_v18  ;;  %v2380_v18 = vcombine.high %v964_v13, %v968_v14 }
 0x163   :  { %665 = vmatpush1.bf16.msra.mxu1 %v2521_v17  ;;  %684 = vmatprep.mubr.bf16.mxu1 %v2848_v25  ;;  %v2378_v17 = vcombine.high %v963_v11, %v967_v12 }
 0x164   :  { %666 = vmatprep.subr.bf16.mxu1 %v2529_v20  ;;  %v2379_v20 = vcombine.low %v964_v13, %v968_v14 }
 0x167   :  { %667 = vmatpush1.bf16.msra.mxu1 %v2527_v22  ;;  %v2562_v22 = vld [vmem:[%s3840_s14 + $0x18] ss:$12 sps:$4 sm:$0xff]  }
 0x168   :  { %746 = vmatprep.subr.bf16.mxu1 %v2535_v24  ;;  %v2568_v24 = vld [vmem:[%s3840_s14 + $0x4] ss:$12 sps:$4 sm:$0xff]  }
 0x222   :  { %v361_v28 = vpop.f32.mrf.mxu1 }
 0x223   :  { %v362_v29 = vadd.f32 %v2332_v27, %v361_v28  ;;  %v2566_v27 = vld [vmem:[%s3840_s14] ss:$12 sps:$4 sm:$0xff]  }
 0x224   :  { %v2452_v30 = vpop.f32.mrf.mxu1  ;;  %v2569_v28 = vld [vmem:[#allocation14] sm:$0xff]  }
 0x225   :  { %v3096_v33 = vpack.c.bf16 %v362_v29, %v362_v29  ;;  %v2570_v29 = vld [vmem:[%s3840_s14 + $0x20] ss:$12 sps:$4 sm:$0xff]  }
 0x226   :  { %v2571_v30 = vld [vmem:[%s3842_s16 + $0x8] sm:$0xff]  }
 0x227   :  { %2362 = vmatmul.mubr.msk.bf16.vlgmr.msra.gmra.mxu0 %vm206_vm1, %v3096_v33  ;;  %2363 = vmatmul.mubr.msk.bf16.vlgmr.msra.gmra.mxu1 %vm206_vm1, %v3096_v33 }
 0x228   :  { %706 = vmatpush1.bf16.msra.mxu0 %v2530_v31  ;;  %747 = vmatpush1.bf16.msra.mxu1 %v2533_v32  ;;  %v2573_v31 = vld [vmem:[%s3842_s16] sm:$0xff]   ;;  %v398_v32 = vlaneseq }
 0x229   :  { %707 = vmatprep.subr.bf16.mxu0 %v2538_v34  ;;  %748 = vmatprep.subr.bf16.mxu1 %v2541_v35 }
 0x22a   :  { %725 = vmatprep.mubr.bf16.mxu0 %v2848_v25  ;;  %766 = vmatprep.mubr.bf16.mxu1 %v2848_v25  ;;  %v3234_v34 = vshrl.u32 %v398_v32, 7 }
 0x22c   :  { %708 = vmatpush1.bf16.msra.mxu0 %v2536_v36  ;;  %749 = vmatpush1.bf16.msra.mxu1 %v2539_v37  ;;  %v3237_v35 = vsub.s32 5, %v3234_v34  ;;  %v3239_v36 = vld [vmem:[#allocation8 + $0x8] sm:$0x3f] }
 0x22d   :  { %787 = vmatprep.subr.bf16.mxu0 %v2544_v38  ;;  %828 = vmatprep.subr.bf16.mxu1 %v2547_v39  ;;  %v3244_v38 = vld [vmem:[#allocation13] sm:$0xff] }
 0x22e   :  { %v453_v37 = vrot.slane %v3239_v36, %v3237_v35 }
 0x22f   :  { %2364 = vmatmul.mubr.msk.bf16.vlgmr.msra.gmra.mxu0 %vm206_vm1, %v3096_v33  ;;  %2365 = vmatmul.mubr.msk.bf16.vlgmr.msra.gmra.mxu1 %vm206_vm1, %v3096_v33 }
 0x230   :  { %788 = vmatpush1.bf16.msra.mxu0 %v2542_v40  ;;  %829 = vmatpush1.bf16.msra.mxu1 %v2545_v41  ;;  %v3256_v41 = vsub.s32 0, %v3234_v34 }
 0x231   :  { %789 = vmatprep.subr.bf16.mxu0 %v2550_v42  ;;  %830 = vmatprep.subr.bf16.mxu1 %v2553_v43  ;;  %v3258_v42 = vld [vmem:[#allocation8] sm:$0xff]  ;;  %v3261_v43 = vsub.s32 2, %v3234_v34 }
 0x232   :  { %807 = vmatprep.mubr.bf16.mxu0 %v2848_v25  ;;  %848 = vmatprep.mubr.bf16.mxu1 %v2848_v25 }
 0x234   :  { %790 = vmatpush1.bf16.msra.mxu0 %v2548_v44  ;;  %831 = vmatpush1.bf16.msra.mxu1 %v2551_v45  ;;  %v401_v44 = vrot.slane %v3258_v42, %v3256_v41 }
 0x235   :  { %869 = vmatprep.subr.bf16.mxu0 %v2556_v46  ;;  %2453 = vmatprep.subr.bf16.mxu1 %v2846_v0  ;;  %v409_v46 = vrot.slane %v3258_v42, %v3261_v43 }
 0x237   :  { %2366 = vmatmul.mubr.msk.bf16.vlgmr.msra.gmra.mxu0 %vm206_vm1, %v3096_v33  ;;  %2367 = vmatmul.mubr.msk.bf16.vlgmr.msra.gmra.mxu1 %vm206_vm1, %v3096_v33 }
 0x238   :  { %870 = vmatpush1.bf16.msra.mxu0 %v2554_v47  ;;  %2454 = vmatpush3.bf16.msra.mxu1 %v2557_v48 }
 0x239   :  { %871 = vmatprep.subr.bf16.mxu0 %v2560_v49  ;;  %2455 = vmatprep.subr.bf16.mxu1 %v2846_v0  ;;  %v3269_v49 = vpop.permute.xlu1 %1562 }
 0x23a   :  { %889 = vmatprep.mubr.bf16.mxu0 %v2848_v25  ;;  %2457 = vmatprep.mubr.msk.bf16.mxu1 %vm2847_vm0, %v2846_v0 }
 0x23c   :  { %872 = vmatpush1.bf16.msra.mxu0 %v2558_v54  ;;  %2456 = vmatpush3.bf16.msra.mxu1 %v2561_v55  ;;  %v3274_v54 = vsub.s32 1, %v3234_v34 }
 0x23d   :  { %1111 = vmatprep.subr.bf16.mxu0 %v2382_v56  ;;  %1152 = vmatprep.subr.bf16.mxu1 %v2384_v57 }
 0x23f   :  { %2368 = vmatmul.mubr.msk.bf16.vlgmr.msra.gmra.mxu0 %vm206_vm1, %v3096_v33  ;;  %2458 = vmatmul.mubr.msk.bf16.vlgmr.msra.gmra.mxu1 %vm206_vm1, %v3096_v33 }
 0x240   :  { %1112 = vmatpush1.bf16.msra.mxu0 %v2381_v62  ;;  %1153 = vmatpush1.bf16.msra.mxu1 %v2383_v63  ;;  %v3284_v62 = vpop.permute.xlu1 %1600  ;;  %v405_v63 = vrot.slane %v3258_v42, %v3274_v54 }
 0x241   :  { %1113 = vmatprep.subr.bf16.mxu0 %v2374_v1  ;;  %1154 = vmatprep.subr.bf16.mxu1 %v2376_v2  ;;  %v3289_v1 = vsub.s32 3, %v3234_v34 }
 0x242   :  { %1131 = vmatprep.mubr.bf16.mxu0 %v2848_v25  ;;  %1172 = vmatprep.mubr.bf16.mxu1 %v2848_v25 }
 0x244   :  { %1114 = vmatpush1.bf16.msra.mxu0 %v2373_v7  ;;  %1155 = vmatpush1.bf16.msra.mxu1 %v2375_v8  ;;  %v3302_v13 = vpop.permute.xlu1 %1628 }
 0x245   :  { %1193 = vmatprep.subr.bf16.mxu0 %v2386_v9  ;;  %1234 = vmatprep.subr.bf16.mxu1 %v2388_v10  ;;  %v413_v9 = vrot.slane %v3258_v42, %v3289_v1 }
 0x247   :  { %2389 = vmatmul.mubr.msk.bf16.vlgmr.msra.gmra.mxu0 %vm206_vm1, %v3096_v33  ;;  %2390 = vmatmul.mubr.msk.bf16.vlgmr.msra.gmra.mxu1 %vm206_vm1, %v3096_v33 }
 0x248   :  { %1194 = vmatpush1.bf16.msra.mxu0 %v2385_v15  ;;  %1235 = vmatpush1.bf16.msra.mxu1 %v2387_v16 }
 0x249   :  { %1195 = vmatprep.subr.bf16.mxu0 %v2378_v17  ;;  %1236 = vmatprep.subr.bf16.mxu1 %v2380_v18  ;;  %v3308_v17 = vsub.s32 4, %v3234_v34 }
 0x24a   :  { %1213 = vmatprep.mubr.bf16.mxu0 %v2848_v25  ;;  %1254 = vmatprep.mubr.bf16.mxu1 %v2848_v25 }
 0x24c   :  { %1196 = vmatpush1.bf16.msra.mxu0 %v2377_v19  ;;  %1237 = vmatpush1.bf16.msra.mxu1 %v2379_v20 }
 0x24d   :  { %2461 = vmatprep.subr.bf16.mxu0 %v2846_v0  ;;  %1395 = vmatprep.subr.bf16.mxu1 %v2564_v21 }
 0x24f   :  { %2391 = vmatmul.mubr.msk.bf16.vlgmr.msra.gmra.mxu0 %vm206_vm1, %v3096_v33  ;;  %2392 = vmatmul.mubr.msk.bf16.vlgmr.msra.gmra.mxu1 %vm206_vm1, %v3096_v33 }
 0x250   :  { %2462 = vmatpush3.bf16.msra.mxu0 %v2565_v23  ;;  %1396 = vmatpush1.bf16.msra.mxu1 %v2562_v22 }
 0x251   :  { %2463 = vmatprep.subr.bf16.mxu0 %v2846_v0  ;;  %1397 = vmatprep.subr.bf16.mxu1 %v2568_v24  ;;  %v3323_v24 = vpop.permute.xlu1 %1656 }
 0x252   :  { %2465 = vmatprep.mubr.msk.bf16.mxu0 %vm2847_vm0, %v2846_v0  ;;  %1415 = vmatprep.mubr.bf16.mxu1 %v2848_v25  ;;  %v2572_v25 = vld [vmem:[%s3840_s14 + $0x8] ss:$12 sps:$4 sm:$0xff]   ;;  %s2861_s14 = smov [#allocation20]  }
 0x253   :  { %s2316_s16 = sshll.u32 %s2861_s14, 4  ;;  %s2317_s16 = int_to_ptr.vmem [resolvable:$true] %s2316_s16 }
 0x254   :  { %2464 = vmatpush3.bf16.msra.mxu0 %v2569_v28  ;;  %1398 = vmatpush1.bf16.msra.mxu1 %v2566_v27  ;;  %v417_v27 = vrot.slane %v3258_v42, %v3308_v17  ;;  %v424_v28 = vsub.s32 6, %v3234_v34  ;;  %p2800_p0 = scmp.lt.s32.totalorder %s2317_s16, %s2317_s16 }
 0x255   :  { %2469 = vmatprep.subr.bf16.mxu0 %v2846_v0  ;;  %2477 = vmatprep.subr.bf16.mxu1 %v2846_v0 }
 0x257   :  { %2466 = vmatmul.mubr.msk.bf16.vlgmr.msra.gmra.mxu0 %vm206_vm1, %v3096_v33  ;;  %2403 = vmatmul.mubr.msk.bf16.vlgmr.msra.gmra.mxu1 %vm206_vm1, %v3096_v33 }
 0x258   :  { %2470 = vmatpush3.bf16.msra.mxu0 %v2570_v29  ;;  %2478 = vmatpush3.bf16.msra.mxu1 %v2571_v30 }
 0x259   :  { %2471 = vmatprep.subr.bf16.mxu0 %v2846_v0  ;;  %2479 = vmatprep.subr.bf16.mxu1 %v2846_v0 }
 0x25a   :  { %2473 = vmatprep.mubr.msk.bf16.mxu0 %vm2847_vm0, %v2846_v0  ;;  %2481 = vmatprep.mubr.msk.bf16.mxu1 %vm2847_vm0, %v2846_v0  ;;  %v428_v0 = vsub.s32 7, %v3234_v34  ;;  %v433_v34 = vrot.slane %v3239_v36, %v3256_v41  ;;  %vm3847_vm0 = vcmask 80896  }
 0x25c   :  { %2472 = vmatpush3.bf16.msra.mxu0 %v2572_v25  ;;  %2480 = vmatpush3.bf16.msra.mxu1 %v2573_v31  ;;  %v3249_v39 = vrot.slane %v3244_v38, %v428_v0 }
 0x25f   :  { %2474 = vmatmul.mubr.msk.bf16.vlgmr.msra.gmra.mxu0 %vm206_vm1, %v3096_v33  ;;  %2482 = vmatmul.mubr.msk.bf16.vlgmr.msra.gmra.mxu1 %vm206_vm1, %v3096_v33  ;;  %v3251_v33 = vpop.permute.xlu0 %1534 }
 0x263   :  { %v3253_v40 = vpop.permute.xlu0 %1545 }
 0x267   :  { %v3265_v45 = vpop.permute.xlu0 %1573 }
 0x26b   :  { %v3280_v59 = vpop.permute.xlu0 %1589 }
 0x26f   :  { %v3321_v23 = vpop.permute.xlu0 %1617 }
 0x2e7   :  { %v645_v47 = vpop.f32.mrf.mxu0  ;;  %v686_v48 = vpop.f32.mrf.mxu1 }
 0x2e8   :  { %v3271_v50 = vadd.f32 %v645_v47, %v401_v44  ;;  %v687_v53 = vadd.f32 %v686_v48, %v409_v46  ;;  %v425_v46 = vrot.slane %v3258_v42, %v424_v28 }
 0x2e9   :  { %v647_v51 = vpop.f32.mrf.mxu0  ;;  %v688_v52 = vpop.f32.mrf.mxu1 }
 0x2ea   :  { %v1548_v55 = vmul.f32 %v3253_v40, %v3271_v50  ;;  %v1537_v56 = vmul.f32 %v3251_v33, %v3271_v50  ;;  %v1577_v2 = vmul.f32 %v3265_v45, %v687_v53  ;;  %v1592_v3 = vmul.f32 %v3280_v59, %v687_v53 }
 0x2eb   :  { %v649_v57 = vpop.f32.mrf.mxu0  ;;  %v690_v58 = vpop.f32.mrf.mxu1  ;;  %v3297_v8 = vadd.f32 %v647_v51, %v405_v63  ;;  %v1603_v10 = vmul.f32 %v3284_v62, %v687_v53  ;;  %v3305_v16 = vadd.f32 %v688_v52, %v413_v9 }
 0x2ec   :  { %1552 = vrot.lane.b32.xlu0 %v1548_v55, %s2860_s13  ;;  %1539 = vrot.lane.b32.xlu1 %v1537_v56, %s2859_s2  ;;  %v3340_v52 = vpop.permute.xlu0 %1639  ;;  %v3342_v53 = vpop.permute.xlu1 %1695 }
 0x2ed   :  { %v650_v60 = vpop.f32.mrf.mxu0  ;;  %v691_v61 = vpop.f32.mrf.mxu1  ;;  %v1565_v18 = vmul.f32 %v3269_v49, %v3297_v8  ;;  %v1604_v29 = vmul.f32 %v3284_v62, %v3305_v16  ;;  %v1631_v47 = vmul.f32 %v3302_v13, %v3305_v16 }
 0x2ef   :  { %v727_v4 = vpop.f32.mrf.mxu0  ;;  %v768_v5 = vpop.f32.mrf.mxu1 }
 0x2f0   :  { %1582 = vrot.lane.b32.xlu0 %v1577_v2, %s2835_s27  ;;  %1594 = vrot.lane.b32.xlu1 %v1592_v3, %s2858_s11  ;;  %v3331_v44 = vadd.f32 %v727_v4, %v417_v27  ;;  %v3345_v57 = vadd.f32 %v768_v5, %v425_v46  ;;  %v990_v2 = vrot.slane %v3244_v38, %v3261_v43  ;;  %v3357_v9 = vpop.permute.xlu0 %1667  ;;  %v3359_v5 = vpop.permute.xlu1 %1723 }
 0x2f1   :  { %v729_v6 = vpop.f32.mrf.mxu0  ;;  %v3295_v7 = vpop.f32.mrf.mxu1 }
 0x2f2   :  { %v1659_v60 = vmul.f32 %v3323_v24, %v3331_v44 }
 0x2f3   :  { %v731_v11 = vpop.f32.mrf.mxu0  ;;  %v772_v12 = vpop.f32.mrf.mxu1 }
 0x2f4   :  { %1607 = vrot.lane.b32.xlu1 %v1603_v10, %s2855_s23  ;;  %v1699_v10 = vmul.f32 %v3342_v53, %v3345_v57  ;;  %v986_v11 = vrot.slane %v3244_v38, %v3274_v54  ;;  %v994_v12 = vrot.slane %v3244_v38, %v3289_v1 }
 0x2f5   :  { %v732_v14 = vpop.f32.mrf.mxu0  ;;  %v773_v15 = vpop.f32.mrf.mxu1 }
 0x2f7   :  { %v3312_v19 = vpop.f32.mrf.mxu0  ;;  %v3314_v20 = vpop.f32.mrf.mxu1 }
 0x2f8   :  { %1567 = vrot.lane.b32.xlu1 %v1565_v18, %s2857_s10 }
 0x2f9   :  { %v3317_v21 = vpop.f32.mrf.mxu0  ;;  %v3319_v22 = vpop.f32.mrf.mxu1 }
 0x2fb   :  { %v813_v30 = vpop.f32.mrf.mxu0  ;;  %v854_v25 = vpop.f32.mrf.mxu1 }
 0x2fc   :  { %1609 = vrot.lane.b32.xlu1 %v1604_v29, %s2855_s23  ;;  %v1528_v30 = vmul.f32 %v3058_v26, %v3271_v50  ;;  %v1726_v25 = vmul.f32 %v3359_v5, %v3345_v57  ;;  %v1006_v50 = vrot.slane %v3244_v38, %v424_v28 }
 0x2fd   :  { %v814_v31 = vpop.f32.mrf.mxu0  ;;  %v855_v32 = vpop.f32.mrf.mxu1 }
 0x2ff   :  { %v3336_v48 = vpop.f32.mrf.mxu0  ;;  %v3338_v51 = vpop.f32.mrf.mxu1 }
 0x300   :  { %1633 = vrot.lane.b32.xlu1 %v1631_v47, %s2837_s7 }
 0x301   :  { %v893_v55 = vpop.f32.mrf.mxu0  ;;  %v2459_v56 = vpop.f32.mrf.mxu1 }
 0x302   :  { %v3350_v58 = vadd.f32 %v893_v55, %v453_v37  ;;  %v421_v37 = vrot.slane %v3258_v42, %v3237_v35  ;;  %v3384_v56 = vpop.permute.xlu0 %1684 }
 0x303   :  { %v895_v61 = vpop.f32.mrf.mxu0  ;;  %v958_v63 = vpop.f32.mrf.mxu1 }
 0x304   :  { %1661 = vrot.lane.b32.xlu1 %v1659_v60, %s2853_s21  ;;  %v3378_v31 = vadd.f32 %v729_v6, %v421_v37  ;;  %v998_v60 = vrot.slane %v3244_v38, %v3308_v17  ;;  %v429_v6 = vrot.slane %v3258_v42, %v428_v0 }
 0x305   :  { %v896_v3 = vpop.f32.mrf.mxu0  ;;  %v2460_v4 = vpop.f32.mrf.mxu1 }
 0x306   :  { %v1687_v3 = vmul.f32 %v3384_v56, %v3378_v31  ;;  %v1002_v4 = vrot.slane %v3244_v38, %v3237_v35 }
 0x307   :  { %v3369_v14 = vpop.f32.mrf.mxu0  ;;  %v1174_v15 = vpop.f32.mrf.mxu1 }
 0x308   :  { %v3371_v18 = vadd.f32 %v1174_v15, %v990_v2  ;;  %1704 = vrot.lane.b32.xlu1 %v1699_v10, %s2851_s9  ;;  %v1530_v2 = vsel %vm1529_vm2, %v1528_v30, 0.0 }
 0x309   :  { %v1135_v27 = vpop.f32.mrf.mxu0  ;;  %v1176_v29 = vpop.f32.mrf.mxu1 }
 0x30a   :  { %v3380_v32 = vadd.f32 %v1135_v27, %v986_v11  ;;  %v3382_v46 = vadd.f32 %v1176_v29, %v994_v12  ;;  %v3406_v12 = vadd.f32 %v3295_v7, %v429_v6  ;;  %v1698_v27 = vmul.f32 %v3342_v53, %v3378_v31 }
 0x30b   :  { %v1137_v47 = vpop.f32.mrf.mxu0  ;;  %v1178_v55 = vpop.f32.mrf.mxu1 }
 0x30c   :  { %1728 = vrot.lane.b32.xlu1 %v1726_v25, %s2849_s19  ;;  %v1334_v55 = vld [vmem:[#allocation17] sm:$0x7]  ;;  %v1746_v7 = vmul.f32 %v3253_v40, %v3406_v12 }
 0x30d   :  { %v1138_v61 = vpop.f32.mrf.mxu0  ;;  %v1179_v63 = vpop.f32.mrf.mxu1 }
 0x30f   :  { %v1215_v37 = vpop.f32.mrf.mxu0  ;;  %v1256_v10 = vpop.f32.mrf.mxu1  ;;  %1531 = vadd.xlane.f32.xlu0 %v1530_v2  ;;  %v441_v2 = vrot.slane %v3239_v36, %v3261_v43 }
 0x310   :  { %v3398_v11 = vadd.f32 %v1215_v37, %v998_v60  ;;  %v3400_v28 = vadd.f32 %v1256_v10, %v1006_v50  ;;  %1689 = vrot.lane.b32.xlu1 %v1687_v3, %s2852_s20  ;;  %v3417_v60 = vadd.f32 %v3312_v19, %v433_v34  ;;  %v1343_v50 = vrot.slane %v1334_v55, %v3274_v54 }
 0x311   :  { %v1217_v0 = vpop.f32.mrf.mxu0  ;;  %v1258_v42 = vpop.f32.mrf.mxu1  ;;  %v1347_v10 = vrot.slane %v1334_v55, %v3261_v43 }
 0x312   :  { %v3408_v15 = vadd.f32 %v1217_v0, %v1002_v4  ;;  %v3411_v35 = vadd.f32 %v1258_v42, %v3249_v39  ;;  %v1747_v19 = vmul.f32 %v3253_v40, %v3417_v60  ;;  %v3436_v42 = vadd.f32 %v3314_v20, %v441_v2 }
 0x313   :  { %v1219_v29 = vpop.f32.mrf.mxu0  ;;  %v1260_v30 = vpop.f32.mrf.mxu1 }
 0x314   :  { %1702 = vrot.lane.b32.xlu1 %v1698_v27, %s2851_s9  ;;  %v437_v27 = vrot.slane %v3239_v36, %v3274_v54  ;;  %v1767_v29 = vmul.f32 %v3265_v45, %v3417_v60  ;;  %v1809_v20 = vmul.f32 %v3302_v13, %v3436_v42  ;;  %v1549_v54 = vmul.f32 %v3253_v40, %v3297_v8 }
 0x315   :  { %v1220_v25 = vpop.f32.mrf.mxu0  ;;  %v1261_v47 = vpop.f32.mrf.mxu1  ;;  %v445_v13 = vrot.slane %v3239_v36, %v3289_v1 }
 0x316   :  { %v812_v55 = vadd.f32 %v3317_v21, %v437_v27  ;;  %v1620_v21 = vmul.f32 %v3321_v23, %v3305_v16 }
 0x317   :  { %v3422_v39 = vpop.f32.mrf.mxu0  ;;  %v3424_v61 = vpop.f32.mrf.mxu1 }
 0x318   :  { %1750 = vrot.lane.b32.xlu1 %v1746_v7, %s2860_s13  ;;  %v1780_v40 = vmul.f32 %v3280_v59, %v812_v55 }
 0x319   :  { %v2467_v63 = vpop.f32.mrf.mxu0  ;;  %v1419_v6 = vpop.f32.mrf.mxu1 }
 0x31a   :  { %v3429_v3 = vadd.f32 %v1419_v6, %v1343_v50 }
 0x31b   :  { %v1323_v4 = vpop.f32.mrf.mxu0  ;;  %v1421_v37 = vpop.f32.mrf.mxu1 }
 0x31c   :  { %1752 = vrot.lane.b32.xlu1 %v1747_v19, %s2860_s13  ;;  %v1768_v19 = vmul.f32 %v3265_v45, %v812_v55  ;;  %v1576_v4 = vmul.f32 %v3265_v45, %v3297_v8  ;;  %v853_v37 = vadd.f32 %v3319_v22, %v445_v13  ;;  %v449_v45 = vrot.slane %v3239_v36, %v3308_v17  ;;  %v1713_v17 = vpop.permute.xlu0 %1712 }
 0x31d   :  { %v2468_v34 = vpop.f32.mrf.mxu0  ;;  %v1422_v0 = vpop.f32.mrf.mxu1  ;;  %v1788_v8 = vmul.f32 %v3284_v62, %v812_v55  ;;  %v1715_v22 = vmul.f32 %v1713_v17, %v3345_v57  ;;  %v1759_v55 = vmul.f32 %v3269_v49, %v3417_v60 }
 0x31e   :  { %v892_v59 = vadd.f32 %v3336_v48, %v449_v45  ;;  %v1830_v1 = vmul.f32 %v3323_v24, %v853_v37  ;;  %v1643_v34 = vmul.f32 %v3340_v52, %v3331_v44  ;;  %v1671_v24 = vmul.f32 %v3357_v9, %v3378_v31 }
 0x31f   :  { %v1458_v30 = vpop.f32.mrf.mxu0  ;;  %v3442_v25 = vpop.f32.mrf.mxu1  ;;  %v1738_v48 = vmul.f32 %v3251_v33, %v3406_v12  ;;  %v1734_v0 = vmul.f32 %v3058_v26, %v3406_v12  ;;  %v1789_v26 = vmul.f32 %v3284_v62, %v3436_v42  ;;  %v1818_v49 = vmul.f32 %v3340_v52, %v853_v37 }
 0x320   :  { %v3444_v47 = vadd.f32 %v1458_v30, %v1347_v10  ;;  %1771 = vrot.lane.b32.xlu1 %v1767_v29, %s2835_s27  ;;  %v1642_v10 = vmul.f32 %v3340_v52, %v3305_v16  ;;  %v1851_v36 = vmul.f32 %v3384_v56, %v892_v59  ;;  %v1670_v16 = vmul.f32 %v3357_v9, %v3331_v44 }
 0x321   :  { %v2475_v7 = vpop.f32.mrf.mxu0  ;;  %v2483_v43 = vpop.f32.mrf.mxu1  ;;  %v1735_v27 = vsel %vm1529_vm2, %v1734_v0, 0.0  ;;  %v1838_v62 = vmul.f32 %v3357_v9, %v853_v37  ;;  %v1880_v37 = vmul.f32 %v3359_v5, %v3350_v58 }
 0x323   :  { %v1461_v50 = vpop.f32.mrf.mxu0  ;;  %v1524_v63 = vpop.f32.mrf.mxu1 }
 0x324   :  { %1811 = vrot.lane.b32.xlu1 %v1809_v20, %s2837_s7  ;;  %v1801_v20 = vmul.f32 %v3321_v23, %v3436_v42  ;;  %v1817_v50 = vmul.f32 %v3340_v52, %v3436_v42  ;;  %v1839_v23 = vmul.f32 %v3357_v9, %v892_v59  ;;  %v1872_v9 = vmul.f32 %v1713_v17, %v3350_v58 }
 0x325   :  { %v2476_v6 = vpop.f32.mrf.mxu0  ;;  %v2484_v2 = vpop.f32.mrf.mxu1  ;;  %1554 = vrot.lane.b32.xlu0 %v1549_v54, %s2860_s13 }
 0x326   :  { %v1859_v2 = vmul.f32 %v3342_v53, %v892_v59 }
 0x328   :  { %1773 = vrot.lane.b32.xlu1 %v1768_v19, %s2835_s27 }
 0x329   :  { %1580 = vrot.lane.b32.xlu0 %v1576_v4, %s2835_s27  ;;  %v1860_v4 = vmul.f32 %v3342_v53, %v3350_v58 }
 0x32c   :  { %1782 = vrot.lane.b32.xlu1 %v1780_v40, %s2858_s11 }
 0x32d   :  { %1622 = vrot.lane.b32.xlu0 %v1620_v21, %s2856_s15 }
 0x330   :  { %1792 = vrot.lane.b32.xlu1 %v1788_v8, %s2855_s23 }
 0x331   :  { %1646 = vrot.lane.b32.xlu0 %v1642_v10, %s2831_s0 }
 0x334   :  { %1832 = vrot.lane.b32.xlu1 %v1830_v1, %s2853_s21 }
 0x335   :  { %1648 = vrot.lane.b32.xlu0 %v1643_v34, %s2831_s0 }
 0x338   :  { %1853 = vrot.lane.b32.xlu1 %v1851_v36, %s2852_s20 }
 0x339   :  { %1674 = vrot.lane.b32.xlu0 %v1670_v16, %s2854_s22 }
 0x33d   :  { %1717 = vrot.lane.b32.xlu0 %v1715_v22, %s2850_s1 }
 0x341   :  { %1676 = vrot.lane.b32.xlu0 %v1671_v24, %s2854_s22 }
 0x345   :  { %1740 = vrot.lane.b32.xlu0 %v1738_v48, %s2859_s2 }
 0x35e   :  { %v1540_v44 = vpop.permute.xlu1 %1539  ;;  %v1553_v54 = vpop.permute.xlu0 %1552 }
 0x35f   :  { %v1542_v56 = vsel %vm1529_vm2, %v1540_v44, 0.0 }
 0x360   :  { %1543 = vadd.xlane.f32.xlu1 %v1542_v56 }
 0x362   :  { %v3496_v57 = vpop.permute.xlu1 %1594  ;;  %v1583_v42 = vpop.permute.xlu0 %1582 }
 0x364   :  { %1736 = vadd.xlane.f32.xlu0 %v1735_v27 }
 0x366   :  { %v1608_v31 = vpop.permute.xlu1 %1607 }
 0x36a   :  { %v1568_v29 = vpop.permute.xlu1 %1567 }
 0x36b   :  { %v1570_v30 = vsel %vm1529_vm2, %v1568_v29, 0.0 }
 0x36c   :  { %1571 = vadd.xlane.f32.xlu1 %v1570_v30  ;;  %v1597_v30 = vsel %vm1529_vm2, %v3496_v57, 0.0 }
 0x36e   :  { %v1610_v33 = vpop.permute.xlu1 %1609 }
 0x36f   :  { %v1612_v10 = vsel %vm1611_vm3, %v1608_v31, %v1610_v33 }
 0x370   :  { %v1614_v1 = vsel %vm1529_vm2, %v1612_v10, 0.0 }
 0x372   :  { %v1634_v7 = vpop.permute.xlu1 %1633 }
 0x373   :  { %v1636_v43 = vsel %vm1529_vm2, %v1634_v7, 0.0 }
 0x374   :  { %1637 = vadd.xlane.f32.xlu1 %v1636_v43 }
 0x376   :  { %v1662_v12 = vpop.permute.xlu1 %1661 }
 0x377   :  { %v1664_v58 = vsel %vm1529_vm2, %v1662_v12, 0.0 }
 0x37a   :  { %1761 = vrot.lane.b32.xlu0 %v1759_v55, %s2857_s10  ;;  %v1705_v63 = vpop.permute.xlu1 %1704 }
 0x37e   :  { %1794 = vrot.lane.b32.xlu0 %v1789_v26, %s2855_s23  ;;  %v1729_v60 = vpop.permute.xlu1 %1728 }
 0x37f   :  { %v1731_v16 = vsel %vm1529_vm2, %v1729_v60, 0.0 }
 0x382   :  { %1803 = vrot.lane.b32.xlu0 %v1801_v20, %s2856_s15  ;;  %v3518_v6 = vpop.permute.xlu1 %1689 }
 0x386   :  { %1821 = vrot.lane.b32.xlu0 %v1817_v50, %s2831_s0  ;;  %v1703_v52 = vpop.permute.xlu1 %1702 }
 0x387   :  { %v1707_v31 = vsel %vm1706_vm5, %v1703_v52, %v1705_v63 }
 0x388   :  { %v1709_v29 = vsel %vm1529_vm2, %v1707_v31, 0.0 }
 0x38a   :  { %1823 = vrot.lane.b32.xlu0 %v1818_v49, %s2831_s0  ;;  %v1751_v40 = vpop.permute.xlu1 %1750  ;;  %s2795_s0 = scalar_lea.vmem %s2317_s16, 32 }
 0x38b   :  { %p2796_p13 = scmp.ne.s32.totalorder %s2317_s16, %s2795_s0  ;;  %p2801_p1 = scmp.lt.s32.totalorder %s2795_s0, %s2795_s0 }
 0x38d   :  { %p2802_p2 = por %p2801_p1, %p2800_p0 }
 0x38e   :  { %1842 = vrot.lane.b32.xlu0 %v1838_v62, %s2854_s22  ;;  %v1753_v53 = vpop.permute.xlu1 %1752  ;;  %v1692_v62 = vsel %vm1529_vm2, %v3518_v6, 0.0 }
 0x38f   :  { %v1754_v43 = vsel %vm3846_vm6, %v1751_v40, %v1753_v53  ;;  %p2803_p3 = pnand %p2802_p2, %p2796_p13 }
 0x390   :  { %v1756_v12 = vsel %vm1529_vm2, %v1754_v43, 0.0 }
 0x392   :  { %1844 = vrot.lane.b32.xlu0 %v1839_v23, %s2854_s22  ;;  %v3537_v36 = vpop.permute.xlu1 %1771 }
 0x396   :  { %1863 = vrot.lane.b32.xlu0 %v1859_v2, %s2851_s9  ;;  %v1812_v17 = vpop.permute.xlu1 %1811 }
 0x397   :  { %v1814_v7 = vsel %vm1529_vm2, %v1812_v17, 0.0 }
 0x398   :  { %v3523_v19 = vpop.xlane.xlu0 %1531 }
 0x39a   :  { %1865 = vrot.lane.b32.xlu0 %v1860_v4, %s2851_s9  ;;  %v1774_v48 = vpop.permute.xlu1 %1773 }
 0x39b   :  { %v1775_v53 = vsel %vm206_vm1, %v3537_v36, %v1774_v48 }
 0x39c   :  { %v1555_v13 = vpop.permute.xlu0 %1554 }
 0x39d   :  { %v1557_v26 = vsel %vm3846_vm6, %v1553_v54, %v1555_v13 }
 0x39e   :  { %1874 = vrot.lane.b32.xlu0 %v1872_v9, %s2850_s1  ;;  %v1783_v27 = vpop.permute.xlu1 %1782  ;;  %v1559_v50 = vsel %vm1529_vm2, %v1557_v26, 0.0 }
 0x3a0   :  { %v1581_v21 = vpop.permute.xlu0 %1580 }
 0x3a1   :  { %v1584_v45 = vsel %vm206_vm1, %v1581_v21, %v1583_v42  ;;  %vm1907_vm1 = vcmask 89088  }
 0x3a2   :  { %1882 = vrot.lane.b32.xlu0 %v1880_v37, %s2849_s19  ;;  %v1586_v8 = vsel %vm1529_vm2, %v1584_v45, 0.0  ;;  %v1793_v33 = vpop.permute.xlu1 %1792 }
 0x3a3   :  { %1587 = vadd.xlane.f32.xlu1 %v1586_v8  ;;  %v1785_v8 = vsel %vm1529_vm2, %v1783_v27, 0.0 }
 0x3a4   :  { %v1623_v59 = vpop.permute.xlu0 %1622 }
 0x3a5   :  { %v1625_v55 = vsel %vm1529_vm2, %v1623_v59, 0.0  ;;  %v1777_v59 = vsel %vm1529_vm2, %v1775_v53, 0.0 }
 0x3a6   :  { %v1833_v20 = vpop.permute.xlu1 %1832 }
 0x3a7   :  { %1615 = vadd.xlane.f32.xlu1 %v1614_v1  ;;  %v1835_v57 = vsel %vm1529_vm2, %v1833_v20, 0.0 }
 0x3a8   :  { %v1647_v34 = vpop.permute.xlu0 %1646 }
 0x3aa   :  { %v1854_v40 = vpop.permute.xlu1 %1853 }
 0x3ab   :  { %1665 = vadd.xlane.f32.xlu1 %v1664_v58  ;;  %v1856_v37 = vsel %vm1529_vm2, %v1854_v40, 0.0 }
 0x3ac   :  { %v1649_v5 = vpop.permute.xlu0 %1648 }
 0x3ad   :  { %v1651_v49 = vsel %vm1650_vm7, %v1647_v34, %v1649_v5 }
 0x3ae   :  { %v1653_v60 = vsel %vm1529_vm2, %v1651_v49, 0.0 }
 0x3af   :  { %1732 = vadd.xlane.f32.xlu1 %v1731_v16 }
 0x3b0   :  { %v1675_v22 = vpop.permute.xlu0 %1674 }
 0x3b4   :  { %v1718_v24 = vpop.permute.xlu0 %1717 }
 0x3b5   :  { %v1720_v63 = vsel %vm1529_vm2, %v1718_v24, 0.0 }
 0x3b8   :  { %v1677_v44 = vpop.permute.xlu0 %1676 }
 0x3b9   :  { %v1679_v56 = vsel %vm1678_vm4, %v1675_v22, %v1677_v44 }
 0x3ba   :  { %v1681_v0 = vsel %vm1529_vm2, %v1679_v56, 0.0 }
 0x3bb   :  { %1682 = vadd.xlane.f32.xlu1 %v1681_v0 }
 0x3bc   :  { %v1741_v54 = vpop.permute.xlu0 %1740 }
 0x3bd   :  { %v1743_v23 = vsel %vm1529_vm2, %v1741_v54, 0.0 }
 0x3bf   :  { %1710 = vadd.xlane.f32.xlu1 %v1709_v29 }
 0x3c1   :  { %1598 = vadd.xlane.f32.xlu0 %v1597_v30 }
 0x3c3   :  { %1815 = vadd.xlane.f32.xlu1 %v1814_v7 }
 0x3c5   :  { %1626 = vadd.xlane.f32.xlu0 %v1625_v55 }
 0x3c7   :  { %1757 = vadd.xlane.f32.xlu1 %v1756_v12 }
 0x3c9   :  { %1560 = vadd.xlane.f32.xlu0 %v1559_v50 }
 0x3cb   :  { %1836 = vadd.xlane.f32.xlu1 %v1835_v57 }
 0x3cd   :  { %1721 = vadd.xlane.f32.xlu0 %v1720_v63 }
 0x3d1   :  { %1654 = vadd.xlane.f32.xlu0 %v1653_v60 }
 0x3d5   :  { %1693 = vadd.xlane.f32.xlu0 %v1692_v62 }
 0x3d9   :  { %1744 = vadd.xlane.f32.xlu0 %v1743_v23 }
 0x3e9   :  { %v1544_v31 = vpop.xlane.xlu1 %1543 }
 0x3ea   :  { %v1889_v26 = vsel %vm1888_vm8, %v3523_v19, %v1544_v31 }
 0x3ed   :  { %v3560_v42 = vpop.xlane.xlu0 %1736 }
 0x3f1   :  { %v1762_v2 = vpop.permute.xlu0 %1761 }
 0x3f2   :  { %v1764_v52 = vsel %vm1529_vm2, %v1762_v2, 0.0 }
 0x3f3   :  { %1765 = vadd.xlane.f32.xlu0 %v1764_v52 }
 0x3f5   :  { %v1795_v4 = vpop.permute.xlu0 %1794  ;;  %v1572_v29 = vpop.xlane.xlu1 %1571 }
 0x3f6   :  { %v1796_v13 = vsel %vm1611_vm3, %v1793_v33, %v1795_v4  ;;  %vm1911_vm3 = vcmask 105472  }
 0x3f7   :  { %v1798_v9 = vsel %vm1529_vm2, %v1796_v13, 0.0 }
 0x3f8   :  { %1799 = vadd.xlane.f32.xlu1 %v1798_v9 }
 0x3f9   :  { %v1804_v21 = vpop.permute.xlu0 %1803 }
 0x3fa   :  { %v1806_v6 = vsel %vm1529_vm2, %v1804_v21, 0.0 }
 0x3fb   :  { %1807 = vadd.xlane.f32.xlu0 %v1806_v6 }
 0x3fc   :  { %1857 = vadd.xlane.f32.xlu1 %v1856_v37 }
 0x3fd   :  { %v1822_v45 = vpop.permute.xlu0 %1821  ;;  %v1638_v30 = vpop.xlane.xlu1 %1637 }
 0x3ff   :  { %1786 = vadd.xlane.f32.xlu0 %v1785_v8 }
 0x401   :  { %v1824_v10 = vpop.permute.xlu0 %1823 }
 0x402   :  { %v1825_v1 = vsel %vm1650_vm7, %v1822_v45, %v1824_v10 }
 0x403   :  { %1778 = vadd.xlane.f32.xlu0 %v1777_v59  ;;  %v1827_v58 = vsel %vm1529_vm2, %v1825_v1, 0.0 }
 0x405   :  { %v1843_v34 = vpop.permute.xlu0 %1842 }
 0x407   :  { %1828 = vadd.xlane.f32.xlu0 %v1827_v58 }
 0x409   :  { %v1845_v5 = vpop.permute.xlu0 %1844 }
 0x40a   :  { %v1846_v16 = vsel %vm1678_vm4, %v1843_v34, %v1845_v5  ;;  %vm1913_vm4 = vcmask 113664  }
 0x40b   :  { %v1848_v17 = vsel %vm1529_vm2, %v1846_v16, 0.0 }
 0x40c   :  { %1849 = vadd.xlane.f32.xlu0 %v1848_v17 }
 0x40d   :  { %v1864_v22 = vpop.permute.xlu0 %1863 }
 0x411   :  { %v1866_v24 = vpop.permute.xlu0 %1865 }
 0x412   :  { %v1867_v48 = vsel %vm1706_vm5, %v1864_v22, %v1866_v24  ;;  %vm1915_vm5 = vcmask 121856  }
 0x413   :  { %v1869_v56 = vsel %vm1529_vm2, %v1867_v48, 0.0 }
 0x415   :  { %v1875_v44 = vpop.permute.xlu0 %1874 }
 0x416   :  { %v1877_v36 = vsel %vm1529_vm2, %v1875_v44, 0.0 }
 0x417   :  { %1878 = vadd.xlane.f32.xlu1 %v1877_v36 }
 0x419   :  { %v1883_v0 = vpop.permute.xlu0 %1882 }
 0x41a   :  { %v1885_v27 = vsel %vm1529_vm2, %v1883_v0, 0.0  ;;  %vm1909_vm2 = vcmask 97280  }
 0x41b   :  { %1870 = vadd.xlane.f32.xlu1 %v1869_v56 }
 0x41f   :  { %1886 = vadd.xlane.f32.xlu1 %v1885_v27 }
 0x42c   :  { %v1588_v33 = vpop.xlane.xlu1 %1587 }
 0x430   :  { %v1616_v43 = vpop.xlane.xlu1 %1615 }
 0x434   :  { %v1666_v12 = vpop.xlane.xlu1 %1665 }
 0x438   :  { %v1733_v54 = vpop.xlane.xlu1 %1732 }
 0x444   :  { %v1683_v4 = vpop.xlane.xlu1 %1682 }
 0x448   :  { %v1711_v37 = vpop.xlane.xlu1 %1710 }
 0x44a   :  { %v1599_v7 = vpop.xlane.xlu0 %1598 }
 0x44c   :  { %v1816_v8 = vpop.xlane.xlu1 %1815 }
 0x44e   :  { %v1627_v55 = vpop.xlane.xlu0 %1626 }
 0x450   :  { %v1758_v59 = vpop.xlane.xlu1 %1757 }
 0x452   :  { %v1561_v20 = vpop.xlane.xlu0 %1560 }
 0x453   :  { %v1891_v50 = vsel %vm1890_vm9, %v1889_v26, %v1561_v20 }
 0x454   :  { %v1893_v57 = vsel %vm1892_vm10, %v1891_v50, %v1572_v29  ;;  %v1837_v17 = vpop.xlane.xlu1 %1836  ;;  %v2369_v50 = vld [vmem:[#allocation10] ss:$0 sm:$0xff] }
 0x455   :  { %v1895_v63 = vsel %vm1894_vm11, %v1893_v57, %v1588_v33 }
 0x456   :  { %v1897_v49 = vsel %vm1896_vm12, %v1895_v63, %v1599_v7  ;;  %v1722_v60 = vpop.xlane.xlu0 %1721  ;;  %v956_v63 = vadd.f32 %v2369_v50, %v3338_v51  ;;  %v982_v51 = vrot.slane %v3244_v38, %v3256_v41 }
 0x457   :  { %v1899_v62 = vsel %vm1898_vm13, %v1897_v49, %v1616_v43 }
 0x458   :  { %v1901_v19 = vsel %vm1900_vm14, %v1899_v62, %v1627_v55 }
 0x459   :  { %v1902_v23 = vsel %vm1650_vm7, %v1901_v19, %v1638_v30 }
 0x45a   :  { %v1655_v2 = vpop.xlane.xlu0 %1654 }
 0x45b   :  { %v1904_v52 = vsel %vm1903_vm15, %v1902_v23, %v1655_v2 }
 0x45c   :  { %v1906_v13 = vsel %vm3847_vm0, %v1904_v52, %v1666_v12 }
 0x45d   :  { %v1908_v9 = vsel %vm1907_vm1, %v1906_v13, %v1683_v4 }
 0x45e   :  { %v1694_v40 = vpop.xlane.xlu0 %1693 }
 0x45f   :  { %v1910_v21 = vsel %vm1909_vm2, %v1908_v9, %v1694_v40 }
 0x460   :  { %v1912_v20 = vsel %vm1911_vm3, %v1910_v21, %v1711_v37 }
 0x461   :  { %v1914_v57 = vsel %vm1913_vm4, %v1912_v20, %v1722_v60  ;;  %v1134_v60 = vadd.f32 %v3369_v14, %v982_v51 }
 0x462   :  { %v1745_v6 = vpop.xlane.xlu0 %1744  ;;  %v1916_v49 = vsel %vm1915_vm5, %v1914_v57, %v1733_v54 }
 0x463   :  { %v1917_v1 = vsel %vm1888_vm8, %v3560_v42, %v1745_v6 }
 0x464   :  { %v1918_v34 = vsel %vm1890_vm9, %v1917_v1, %v1758_v59 }
 0x47c   :  { %v1766_v45 = vpop.xlane.xlu0 %1765 }
 0x47d   :  { %v1919_v5 = vsel %vm1892_vm10, %v1918_v34, %v1766_v45 }
 0x481   :  { %v1800_v24 = vpop.xlane.xlu1 %1799 }
 0x484   :  { %v1808_v53 = vpop.xlane.xlu0 %1807 }
 0x485   :  { %v1858_v0 = vpop.xlane.xlu1 %1857 }
 0x488   :  { %v1787_v10 = vpop.xlane.xlu0 %1786 }
 0x48c   :  { %v1779_v58 = vpop.xlane.xlu0 %1778 }
 0x48d   :  { %v1920_v16 = vsel %vm1894_vm11, %v1919_v5, %v1779_v58 }
 0x48e   :  { %v1921_v22 = vsel %vm1896_vm12, %v1920_v16, %v1787_v10 }
 0x48f   :  { %v1922_v44 = vsel %vm1898_vm13, %v1921_v22, %v1800_v24 }
 0x490   :  { %v1923_v36 = vsel %vm1900_vm14, %v1922_v44, %v1808_v53  ;;  %v1829_v48 = vpop.xlane.xlu0 %1828 }
 0x491   :  { %v1924_v56 = vsel %vm1650_vm7, %v1923_v36, %v1816_v8 }
 0x492   :  { %v1925_v42 = vsel %vm1903_vm15, %v1924_v56, %v1829_v48 }
 0x493   :  { %v1926_v31 = vsel %vm3847_vm0, %v1925_v42, %v1837_v17 }
 0x495   :  { %v1850_v27 = vpop.xlane.xlu0 %1849 }
 0x496   :  { %v1927_v30 = vsel %vm1907_vm1, %v1926_v31, %v1850_v27 }
 0x497   :  { %v1928_v7 = vsel %vm1909_vm2, %v1927_v30, %v1858_v0 }
 0x4a0   :  { %v1879_v29 = vpop.xlane.xlu1 %1878 }
 0x4a4   :  { %v1871_v33 = vpop.xlane.xlu1 %1870 }
 0x4a5   :  { %v1929_v43 = vsel %vm1911_vm3, %v1928_v7, %v1871_v33 }
 0x4a6   :  { %v1930_v26 = vsel %vm1913_vm4, %v1929_v43, %v1879_v29 }
 0x4a8   :  { %v1887_v55 = vpop.xlane.xlu1 %1886 }
 0x4a9   :  { %v1931_v12 = vsel %vm1915_vm5, %v1930_v26, %v1887_v55 }
 0x4aa   :  { %1933 = vrot.lane.b32.xlu0 %v1931_v12, %s2860_s13 }
 0x51c   :  { %v1934_v62 = vpop.permute.xlu0 %1933 }
 0x51d   :  { %v1936_v19 = vsel %vm3846_vm6, %v1916_v49, %v1934_v62  ;;  %vm1940_vm6 = vcmask 254976  }
 0x51e   :  { %v1937_v23 = vadd.f32 %v1936_v19, %v956_v63 }
 0x520   :  { %v3614_v2 = vmax.f32 %v1937_v23, 0.0 }
 0x522   :  { %1956 = vrot.lane.b32.xlu1 %v3614_v2, %s2837_s7  ;;  %1945 = vrot.lane.b32.xlu0 %v3614_v2, %s2835_s27  ;;  %v2006_v54 = vmul.f32 %v3614_v2, %v3371_v18  ;;  %v1939_v52 = vmul.f32 %v3614_v2, %v1134_v60  ;;  %v2062_v13 = vmul.f32 %v3614_v2, %v3398_v11 }
 0x523   :  { %v1978_v40 = vmul.f32 %v3614_v2, %v3380_v32  ;;  %v2118_v14 = vmul.f32 %v3614_v2, %v3400_v28  ;;  %v2034_v6 = vmul.f32 %v3614_v2, %v3382_v46  ;;  %v2090_v8 = vmul.f32 %v3614_v2, %v3408_v15 }
 0x524   :  { %v2007_v4 = vsel %vm1940_vm6, %v2006_v54, 0.0  ;;  %v1941_v9 = vsel %vm1940_vm6, %v1939_v52, 0.0  ;;  %v2063_v38 = vsel %vm1940_vm6, %v2062_v13, 0.0 }
 0x525   :  { %v1979_v21 = vsel %vm1940_vm6, %v1978_v40, 0.0  ;;  %v2119_v37 = vsel %vm1940_vm6, %v2118_v14, 0.0  ;;  %v2035_v45 = vsel %vm1940_vm6, %v2034_v6, 0.0  ;;  %v2091_v53 = vsel %vm1940_vm6, %v2090_v8, 0.0 }
 0x526   :  { %1967 = vrot.lane.b32.xlu0 %v3614_v2, %s2852_s20 }
 0x545   :  { %2008 = vadd.xlane.f32.xlu0 %v2007_v4 }
 0x546   :  { %1942 = vadd.xlane.f32.xlu1 %v1941_v9 }
 0x549   :  { %2064 = vadd.xlane.f32.xlu0 %v2063_v38 }
 0x54a   :  { %1980 = vadd.xlane.f32.xlu1 %v1979_v21 }
 0x54d   :  { %2120 = vadd.xlane.f32.xlu0 %v2119_v37 }
 0x54e   :  { %2036 = vadd.xlane.f32.xlu1 %v2035_v45 }
 0x552   :  { %2092 = vadd.xlane.f32.xlu1 %v2091_v53 }
 0x594   :  { %v1946_v10 = vpop.permute.xlu0 %1945  ;;  %v1957_v1 = vpop.permute.xlu1 %1956 }
 0x595   :  { %v1948_v59 = vmul.f32 %v1946_v10, %v1134_v60  ;;  %v1959_v5 = vmul.f32 %v1957_v1, %v1134_v60  ;;  %v1990_v16 = vmul.f32 %v1957_v1, %v3380_v32  ;;  %v1982_v17 = vmul.f32 %v1946_v10, %v3380_v32 }
 0x596   :  { %v2010_v22 = vmul.f32 %v1946_v10, %v3371_v18  ;;  %v2018_v36 = vmul.f32 %v1957_v1, %v3371_v18  ;;  %v2046_v48 = vmul.f32 %v1957_v1, %v3382_v46  ;;  %v2038_v56 = vmul.f32 %v1946_v10, %v3382_v46 }
 0x597   :  { %1950 = vrot.lane.b32.xlu1 %v1948_v59, %s2852_s20  ;;  %v2074_v42 = vmul.f32 %v1957_v1, %v3398_v11  ;;  %v2102_v27 = vmul.f32 %v1957_v1, %v3408_v15  ;;  %v2094_v31 = vmul.f32 %v1946_v10, %v3408_v15  ;;  %v2150_v33 = vmul.f32 %v1946_v10, %v3411_v35 }
 0x598   :  { %v3646_v34 = vpop.permute.xlu0 %1967  ;;  %v2158_v7 = vmul.f32 %v1957_v1, %v3411_v35 }
 0x599   :  { %v1970_v58 = vmul.f32 %v3646_v34, %v1134_v60  ;;  %v1998_v24 = vmul.f32 %v3646_v34, %v3380_v32  ;;  %v2026_v44 = vmul.f32 %v3646_v34, %v3371_v18  ;;  %v2066_v32 = vmul.f32 %v1946_v10, %v3398_v11 }
 0x59a   :  { %v2054_v0 = vmul.f32 %v3646_v34, %v3382_v46  ;;  %v2082_v18 = vmul.f32 %v3646_v34, %v3398_v11  ;;  %v2122_v46 = vmul.f32 %v1946_v10, %v3400_v28  ;;  %v2110_v29 = vmul.f32 %v3646_v34, %v3408_v15 }
 0x59b   :  { %1972 = vrot.lane.b32.xlu0 %v1970_v58, %s2835_s27  ;;  %1961 = vrot.lane.b32.xlu1 %v1959_v5, %s2837_s7  ;;  %v2130_v11 = vmul.f32 %v1957_v1, %v3400_v28  ;;  %v2138_v30 = vmul.f32 %v3646_v34, %v3400_v28 }
 0x59f   :  { %1992 = vrot.lane.b32.xlu0 %v1990_v16, %s2837_s7  ;;  %1984 = vrot.lane.b32.xlu1 %v1982_v17, %s2852_s20 }
 0x5a3   :  { %2012 = vrot.lane.b32.xlu0 %v2010_v22, %s2852_s20  ;;  %2000 = vrot.lane.b32.xlu1 %v1998_v24, %s2835_s27 }
 0x5a7   :  { %2028 = vrot.lane.b32.xlu0 %v2026_v44, %s2835_s27  ;;  %2020 = vrot.lane.b32.xlu1 %v2018_v36, %s2837_s7 }
 0x5ab   :  { %2048 = vrot.lane.b32.xlu0 %v2046_v48, %s2837_s7  ;;  %2040 = vrot.lane.b32.xlu1 %v2038_v56, %s2852_s20 }
 0x5af   :  { %2068 = vrot.lane.b32.xlu0 %v2066_v32, %s2852_s20  ;;  %2056 = vrot.lane.b32.xlu1 %v2054_v0, %s2835_s27 }
 0x5b3   :  { %2084 = vrot.lane.b32.xlu0 %v2082_v18, %s2835_s27  ;;  %2076 = vrot.lane.b32.xlu1 %v2074_v42, %s2837_s7 }
 0x5b7   :  { %2104 = vrot.lane.b32.xlu0 %v2102_v27, %s2837_s7  ;;  %2096 = vrot.lane.b32.xlu1 %v2094_v31, %s2852_s20  ;;  %v2146_v27 = vmul.f32 %v3614_v2, %v3411_v35 }
 0x5bb   :  { %2124 = vrot.lane.b32.xlu0 %v2122_v46, %s2852_s20  ;;  %2112 = vrot.lane.b32.xlu1 %v2110_v29, %s2835_s27  ;;  %v2147_v46 = vsel %vm1940_vm6, %v2146_v27, 0.0 }
 0x5bf   :  { %2132 = vrot.lane.b32.xlu1 %v2130_v11, %s2837_s7 }
 0x5c3   :  { %2140 = vrot.lane.b32.xlu1 %v2138_v30, %s2835_s27 }
 0x5c7   :  { %2152 = vrot.lane.b32.xlu1 %v2150_v33, %s2852_s20 }
 0x5cb   :  { %2160 = vrot.lane.b32.xlu1 %v2158_v7, %s2837_s7  ;;  %v2166_v7 = vmul.f32 %v3646_v34, %v3411_v35 }
 0x5ce   :  { %v3701_v55 = vpop.xlane.xlu0 %2008 }
 0x5cf   :  { %v3697_v15 = vpop.xlane.xlu1 %1942 }
 0x5d2   :  { %v3705_v12 = vpop.xlane.xlu0 %2064 }
 0x5d3   :  { %v3699_v43 = vpop.xlane.xlu1 %1980 }
 0x5d6   :  { %v3709_v20 = vpop.xlane.xlu0 %2120 }
 0x5d7   :  { %v3703_v26 = vpop.xlane.xlu1 %2036 }
 0x5db   :  { %v3707_v28 = vpop.xlane.xlu1 %2092 }
 0x609   :  { %v1951_v50 = vpop.permute.xlu1 %1950 }
 0x60a   :  { %v1953_v57 = vsel %vm1940_vm6, %v1951_v50, 0.0 }
 0x60b   :  { %1954 = vadd.xlane.f32.xlu0 %v1953_v57 }
 0x60d   :  { %v1973_v63 = vpop.permute.xlu0 %1972  ;;  %v1962_v49 = vpop.permute.xlu1 %1961 }
 0x60e   :  { %v1975_v62 = vsel %vm1940_vm6, %v1973_v63, 0.0  ;;  %v1964_v19 = vsel %vm1940_vm6, %v1962_v49, 0.0 }
 0x60f   :  { %1976 = vadd.xlane.f32.xlu0 %v1975_v62  ;;  %1965 = vadd.xlane.f32.xlu1 %v1964_v19 }
 0x611   :  { %v1993_v23 = vpop.permute.xlu0 %1992  ;;  %v1985_v51 = vpop.permute.xlu1 %1984 }
 0x612   :  { %v1995_v60 = vsel %vm1940_vm6, %v1993_v23, 0.0  ;;  %v1987_v54 = vsel %vm1940_vm6, %v1985_v51, 0.0 }
 0x613   :  { %1996 = vadd.xlane.f32.xlu0 %v1995_v60  ;;  %1988 = vadd.xlane.f32.xlu1 %v1987_v54 }
 0x615   :  { %v2013_v52 = vpop.permute.xlu0 %2012  ;;  %v2001_v4 = vpop.permute.xlu1 %2000 }
 0x616   :  { %v2015_v13 = vsel %vm1940_vm6, %v2013_v52, 0.0  ;;  %v2003_v9 = vsel %vm1940_vm6, %v2001_v4, 0.0 }
 0x617   :  { %2016 = vadd.xlane.f32.xlu0 %v2015_v13  ;;  %2004 = vadd.xlane.f32.xlu1 %v2003_v9 }
 0x619   :  { %v2029_v40 = vpop.permute.xlu0 %2028  ;;  %v2021_v38 = vpop.permute.xlu1 %2020 }
 0x61a   :  { %v2031_v14 = vsel %vm1940_vm6, %v2029_v40, 0.0  ;;  %v2023_v21 = vsel %vm1940_vm6, %v2021_v38, 0.0 }
 0x61b   :  { %2032 = vadd.xlane.f32.xlu0 %v2031_v14  ;;  %2024 = vadd.xlane.f32.xlu1 %v2023_v21 }
 0x61d   :  { %v2049_v6 = vpop.permute.xlu0 %2048  ;;  %v2041_v37 = vpop.permute.xlu1 %2040 }
 0x61e   :  { %v2051_v45 = vsel %vm1940_vm6, %v2049_v6, 0.0  ;;  %v2043_v8 = vsel %vm1940_vm6, %v2041_v37, 0.0 }
 0x61f   :  { %2052 = vadd.xlane.f32.xlu0 %v2051_v45  ;;  %2044 = vadd.xlane.f32.xlu1 %v2043_v8 }
 0x621   :  { %v2069_v53 = vpop.permute.xlu0 %2068  ;;  %v2057_v10 = vpop.permute.xlu1 %2056 }
 0x622   :  { %v2071_v59 = vsel %vm1940_vm6, %v2069_v53, 0.0  ;;  %v2059_v1 = vsel %vm1940_vm6, %v2057_v10, 0.0 }
 0x623   :  { %2072 = vadd.xlane.f32.xlu0 %v2071_v59  ;;  %2060 = vadd.xlane.f32.xlu1 %v2059_v1 }
 0x625   :  { %v2085_v58 = vpop.permute.xlu0 %2084  ;;  %v2077_v5 = vpop.permute.xlu1 %2076 }
 0x626   :  { %v2087_v16 = vsel %vm1940_vm6, %v2085_v58, 0.0  ;;  %v2079_v17 = vsel %vm1940_vm6, %v2077_v5, 0.0 }
 0x627   :  { %2088 = vadd.xlane.f32.xlu0 %v2087_v16  ;;  %2080 = vadd.xlane.f32.xlu1 %v2079_v17 }
 0x629   :  { %v2105_v22 = vpop.permute.xlu0 %2104  ;;  %v2097_v24 = vpop.permute.xlu1 %2096 }
 0x62a   :  { %v2107_v44 = vsel %vm1940_vm6, %v2105_v22, 0.0  ;;  %v2099_v36 = vsel %vm1940_vm6, %v2097_v24, 0.0 }
 0x62b   :  { %2108 = vadd.xlane.f32.xlu0 %v2107_v44  ;;  %2100 = vadd.xlane.f32.xlu1 %v2099_v36 }
 0x62d   :  { %v2125_v48 = vpop.permute.xlu0 %2124  ;;  %v2113_v56 = vpop.permute.xlu1 %2112 }
 0x62e   :  { %v2127_v32 = vsel %vm1940_vm6, %v2125_v48, 0.0  ;;  %v2115_v0 = vsel %vm1940_vm6, %v2113_v56, 0.0 }
 0x62f   :  { %2128 = vadd.xlane.f32.xlu0 %v2127_v32  ;;  %2116 = vadd.xlane.f32.xlu1 %v2115_v0 }
 0x631   :  { %v2133_v18 = vpop.permute.xlu1 %2132 }
 0x632   :  { %v2135_v42 = vsel %vm1940_vm6, %v2133_v18, 0.0 }
 0x633   :  { %2136 = vadd.xlane.f32.xlu1 %v2135_v42 }
 0x635   :  { %v2141_v31 = vpop.permute.xlu1 %2140 }
 0x636   :  { %v2143_v2 = vsel %vm1940_vm6, %v2141_v31, 0.0 }
 0x637   :  { %2148 = vadd.xlane.f32.xlu1 %v2147_v46 }
 0x639   :  { %v2153_v29 = vpop.permute.xlu1 %2152 }
 0x63a   :  { %v2155_v11 = vsel %vm1940_vm6, %v2153_v29, 0.0 }
 0x63b   :  { %2156 = vadd.xlane.f32.xlu1 %v2155_v11 }
 0x63d   :  { %v2161_v30 = vpop.permute.xlu1 %2160 }
 0x63e   :  { %v2163_v33 = vsel %vm1940_vm6, %v2161_v30, 0.0 }
 0x63f   :  { %2164 = vadd.xlane.f32.xlu1 %v2163_v33 }
 0x645   :  { %2168 = vrot.lane.b32.xlu0 %v2166_v7, %s2835_s27 }
 0x664   :  { %2144 = vadd.xlane.f32.xlu0 %v2143_v2  ;;  %v2393_v2 = vld [vmem:[#allocation16] ss:$0 sm:$0xff] }
 0x694   :  { %v1955_v50 = vpop.xlane.xlu0 %1954 }
 0x695   :  { %v2174_v57 = vsel %vm1888_vm8, %v3697_v15, %v1955_v50  ;;  %v1321_v50 = vadd.f32 %v2393_v2, %v3422_v39 }
 0x698   :  { %v1977_v63 = vpop.xlane.xlu0 %1976  ;;  %v1966_v49 = vpop.xlane.xlu1 %1965 }
 0x699   :  { %v2175_v62 = vsel %vm1890_vm9, %v2174_v57, %v1966_v49 }
 0x69a   :  { %v2176_v19 = vsel %vm1892_vm10, %v2175_v62, %v1977_v63 }
 0x69b   :  { %v2177_v23 = vsel %vm1894_vm11, %v2176_v19, %v3699_v43  ;;  %v2574_v19 = vld [vmem:[#allocation17] sm:$0x7] }
 0x69c   :  { %v1997_v51 = vpop.xlane.xlu0 %1996  ;;  %v1989_v35 = vpop.xlane.xlu1 %1988 }
 0x69d   :  { %v2178_v34 = vsel %vm1896_vm12, %v2177_v23, %v1989_v35  ;;  %v1339_v23 = vrot.slane %v2574_v19, %v3256_v41 }
 0x69e   :  { %v2179_v60 = vsel %vm1898_vm13, %v2178_v34, %v1997_v51 }
 0x69f   :  { %v1418_v51 = vadd.f32 %v3424_v61, %v1339_v23 }
 0x6a0   :  { %v2017_v54 = vpop.xlane.xlu0 %2016  ;;  %v2005_v52 = vpop.xlane.xlu1 %2004 }
 0x6a1   :  { %v2180_v4 = vsel %vm1900_vm14, %v2179_v60, %v2005_v52 }
 0x6a2   :  { %v2181_v15 = vsel %vm1650_vm7, %v2180_v4, %v3701_v55 }
 0x6a3   :  { %v2182_v13 = vsel %vm1903_vm15, %v2181_v15, %v2017_v54 }
 0x6a4   :  { %v2033_v9 = vpop.xlane.xlu0 %2032  ;;  %v2025_v40 = vpop.xlane.xlu1 %2024 }
 0x6a5   :  { %v2183_v38 = vsel %vm3847_vm0, %v2182_v13, %v2025_v40 }
 0x6a6   :  { %v2184_v43 = vsel %vm1907_vm1, %v2183_v38, %v2033_v9 }
 0x6a7   :  { %v2185_v14 = vsel %vm1909_vm2, %v2184_v43, %v3703_v26 }
 0x6a8   :  { %v2053_v21 = vpop.xlane.xlu0 %2052  ;;  %v2045_v6 = vpop.xlane.xlu1 %2044 }
 0x6a9   :  { %v2186_v37 = vsel %vm1911_vm3, %v2185_v14, %v2045_v6 }
 0x6aa   :  { %v2187_v45 = vsel %vm1913_vm4, %v2186_v37, %v2053_v21 }
 0x6ac   :  { %v2073_v8 = vpop.xlane.xlu0 %2072  ;;  %v2061_v53 = vpop.xlane.xlu1 %2060 }
 0x6ad   :  { %v2188_v55 = vsel %vm1915_vm5, %v2187_v45, %v2061_v53  ;;  %v2189_v10 = vsel %vm1888_vm8, %v3705_v12, %v2073_v8 }
 0x6b0   :  { %v2089_v59 = vpop.xlane.xlu0 %2088  ;;  %v2081_v1 = vpop.xlane.xlu1 %2080 }
 0x6b1   :  { %v2190_v58 = vsel %vm1890_vm9, %v2189_v10, %v2081_v1 }
 0x6b2   :  { %v2191_v5 = vsel %vm1892_vm10, %v2190_v58, %v2089_v59 }
 0x6b3   :  { %v2192_v26 = vsel %vm1894_vm11, %v2191_v5, %v3707_v28 }
 0x6b4   :  { %v2109_v16 = vpop.xlane.xlu0 %2108  ;;  %v2101_v17 = vpop.xlane.xlu1 %2100 }
 0x6b5   :  { %v2193_v22 = vsel %vm1896_vm12, %v2192_v26, %v2101_v17 }
 0x6b6   :  { %v2194_v24 = vsel %vm1898_vm13, %v2193_v22, %v2109_v16 }
 0x6b8   :  { %v2129_v44 = vpop.xlane.xlu0 %2128  ;;  %v2117_v36 = vpop.xlane.xlu1 %2116 }
 0x6b9   :  { %v2195_v48 = vsel %vm1900_vm14, %v2194_v24, %v2117_v36 }
 0x6ba   :  { %v2196_v12 = vsel %vm1650_vm7, %v2195_v48, %v3709_v20 }
 0x6bb   :  { %v2197_v56 = vsel %vm1903_vm15, %v2196_v12, %v2129_v44 }
 0x6bc   :  { %v2169_v32 = vpop.permute.xlu0 %2168  ;;  %v2137_v28 = vpop.xlane.xlu1 %2136 }
 0x6bd   :  { %v2171_v0 = vsel %vm1940_vm6, %v2169_v32, 0.0  ;;  %v2198_v27 = vsel %vm3847_vm0, %v2197_v56, %v2137_v28  ;;  %vm3854_vm0 = vcmask 130048  }
 0x6be   :  { %2172 = vadd.xlane.f32.xlu1 %v2171_v0 }
 0x6c0   :  { %v2149_v18 = vpop.xlane.xlu1 %2148 }
 0x6c4   :  { %v2157_v31 = vpop.xlane.xlu1 %2156 }
 0x6c8   :  { %v2165_v11 = vpop.xlane.xlu1 %2164 }
 0x6ed   :  { %v2145_v42 = vpop.xlane.xlu0 %2144 }
 0x6ee   :  { %v2199_v46 = vsel %vm1907_vm1, %v2198_v27, %v2145_v42 }
 0x6ef   :  { %v2200_v29 = vsel %vm1909_vm2, %v2199_v46, %v2149_v18 }
 0x6f0   :  { %v2201_v30 = vsel %vm1911_vm3, %v2200_v29, %v2157_v31 }
 0x6f1   :  { %v2202_v20 = vsel %vm1913_vm4, %v2201_v30, %v2165_v11 }
 0x747   :  { %v2173_v33 = vpop.xlane.xlu1 %2172 }
 0x748   :  { %v2203_v7 = vsel %vm1915_vm5, %v2202_v20, %v2173_v33  ;;  %v2405_v33 = vld [vmem:[#allocation19] ss:$0 sm:$0xff] }
 0x749   :  { %2205 = vrot.lane.b32.xlu1 %v2203_v7, %s2860_s13  ;;  %v1522_v7 = vadd.f32 %v2405_v33, %v3442_v25 }
 0x7bb   :  { %v2206_v57 = vpop.permute.xlu1 %2205 }
 0x7bc   :  { %v2208_v63 = vsel %vm3854_vm0, %v2188_v55, %v2206_v57 }
 0x7bd   :  { %v2209_v49 = vadd.f32 %v2208_v63, %v1321_v50 }
 0x7bf   :  { %v2210_v62 = vmax.f32 %v2209_v49, 0.0 }
 0x7c1   :  { %2238 = vrot.lane.b32.xlu1 %v2210_v62, %s2852_s20  ;;  %2216 = vrot.lane.b32.xlu0 %v2210_v62, %s2835_s27  ;;  %v2211_v35 = vmul.f32 %v2210_v62, %v1418_v51  ;;  %v2277_v34 = vmul.f32 %v2210_v62, %v3444_v47  ;;  %v2249_v60 = vmul.f32 %v2210_v62, %v3429_v3 }
 0x7c3   :  { %v2212_v39 = vsel %vm1940_vm6, %v2211_v35, 0.0  ;;  %v2278_v54 = vsel %vm1940_vm6, %v2277_v34, 0.0  ;;  %v2250_v52 = vsel %vm1940_vm6, %v2249_v60, 0.0 }
 0x7c5   :  { %2227 = vrot.lane.b32.xlu0 %v2210_v62, %s2837_s7 }
 0x7e4   :  { %2213 = vadd.xlane.f32.xlu0 %v2212_v39 }
 0x7e5   :  { %2279 = vadd.xlane.f32.xlu1 %v2278_v54 }
 0x7e8   :  { %2251 = vadd.xlane.f32.xlu0 %v2250_v52 }
 0x833   :  { %v2217_v4 = vpop.permute.xlu0 %2216  ;;  %v2239_v9 = vpop.permute.xlu1 %2238 }
 0x834   :  { %v2219_v15 = vmul.f32 %v2217_v4, %v1418_v51  ;;  %v2253_v61 = vmul.f32 %v2217_v4, %v3429_v3  ;;  %v2241_v40 = vmul.f32 %v2239_v9, %v1418_v51  ;;  %v2281_v38 = vmul.f32 %v2217_v4, %v3444_v47 }
 0x835   :  { %v2269_v14 = vmul.f32 %v2239_v9, %v3429_v3 }
 0x836   :  { %2221 = vrot.lane.b32.xlu1 %v2219_v15, %s2852_s20 }
 0x837   :  { %v2228_v41 = vpop.permute.xlu0 %2227 }
 0x838   :  { %v2230_v13 = vmul.f32 %v2228_v41, %v1418_v51  ;;  %v2261_v43 = vmul.f32 %v2228_v41, %v3429_v3  ;;  %v2289_v24 = vmul.f32 %v2228_v41, %v3444_v47 }
 0x83a   :  { %2255 = vrot.lane.b32.xlu1 %v2253_v61, %s2852_s20  ;;  %2232 = vrot.lane.b32.xlu0 %v2230_v13, %s2837_s7 }
 0x83e   :  { %2283 = vrot.lane.b32.xlu1 %v2281_v38, %s2852_s20  ;;  %2243 = vrot.lane.b32.xlu0 %v2241_v40, %s2835_s27 }
 0x842   :  { %2263 = vrot.lane.b32.xlu0 %v2261_v43, %s2837_s7 }
 0x846   :  { %2271 = vrot.lane.b32.xlu0 %v2269_v14, %s2835_s27 }
 0x86d   :  { %v2214_v21 = vpop.xlane.xlu0 %2213 }
 0x86e   :  { %v2280_v6 = vpop.xlane.xlu1 %2279 }
 0x871   :  { %v2252_v37 = vpop.xlane.xlu0 %2251 }
 0x8a8   :  { %v2222_v45 = vpop.permute.xlu1 %2221 }
 0x8a9   :  { %v2224_v8 = vsel %vm1940_vm6, %v2222_v45, 0.0 }
 0x8aa   :  { %2225 = vadd.xlane.f32.xlu1 %v2224_v8 }
 0x8ac   :  { %v2233_v53 = vpop.permute.xlu0 %2232  ;;  %v2256_v10 = vpop.permute.xlu1 %2255 }
 0x8ad   :  { %v2235_v55 = vsel %vm1940_vm6, %v2233_v53, 0.0  ;;  %v2258_v1 = vsel %vm1940_vm6, %v2256_v10, 0.0 }
 0x8ae   :  { %2236 = vadd.xlane.f32.xlu0 %v2235_v55 }
 0x8b0   :  { %v2244_v59 = vpop.permute.xlu0 %2243  ;;  %v2284_v17 = vpop.permute.xlu1 %2283 }
 0x8b1   :  { %v2246_v58 = vsel %vm1940_vm6, %v2244_v59, 0.0  ;;  %v2286_v22 = vsel %vm1940_vm6, %v2284_v17, 0.0 }
 0x8b2   :  { %2259 = vadd.xlane.f32.xlu0 %v2258_v1  ;;  %2247 = vadd.xlane.f32.xlu1 %v2246_v58 }
 0x8b4   :  { %v2264_v3 = vpop.permute.xlu0 %2263 }
 0x8b5   :  { %v2266_v5 = vsel %vm1940_vm6, %v2264_v3, 0.0 }
 0x8b6   :  { %2267 = vadd.xlane.f32.xlu1 %v2266_v5 }
 0x8b8   :  { %v2272_v26 = vpop.permute.xlu0 %2271 }
 0x8b9   :  { %v2274_v16 = vsel %vm1940_vm6, %v2272_v26, 0.0 }
 0x8ba   :  { %2275 = vadd.xlane.f32.xlu0 %v2274_v16 }
 0x8be   :  { %2287 = vadd.xlane.f32.xlu0 %v2286_v22 }
 0x8d4   :  { %2291 = vrot.lane.b32.xlu0 %v2289_v24, %s2837_s7 }
 0x933   :  { %v2226_v44 = vpop.xlane.xlu1 %2225 }
 0x934   :  { %v2297_v48 = vsel %vm1888_vm8, %v2214_v21, %v2226_v44  ;;  %vm3855_vm8 = vcmask 80896  }
 0x937   :  { %v2237_v36 = vpop.xlane.xlu0 %2236 }
 0x938   :  { %v2298_v12 = vsel %vm1890_vm9, %v2297_v48, %v2237_v36  ;;  %vm2308_vm9 = vcmask 82944  }
 0x93b   :  { %v2248_v56 = vpop.xlane.xlu1 %2247  ;;  %v2260_v28 = vpop.xlane.xlu0 %2259 }
 0x93c   :  { %v2299_v32 = vsel %vm1892_vm10, %v2298_v12, %v2248_v56 }
 0x93d   :  { %v2300_v0 = vsel %vm1894_vm11, %v2299_v32, %v2252_v37 }
 0x93e   :  { %v2301_v18 = vsel %vm1896_vm12, %v2300_v0, %v2260_v28 }
 0x93f   :  { %v2268_v42 = vpop.xlane.xlu1 %2267 }
 0x940   :  { %v2302_v27 = vsel %vm1898_vm13, %v2301_v18, %v2268_v42 }
 0x943   :  { %v2276_v47 = vpop.xlane.xlu0 %2275 }
 0x944   :  { %v2303_v31 = vsel %vm1900_vm14, %v2302_v27, %v2276_v47 }
 0x945   :  { %v2304_v46 = vsel %vm1650_vm7, %v2303_v31, %v2280_v6 }
 0x947   :  { %v2288_v29 = vpop.xlane.xlu0 %2287 }
 0x948   :  { %v2305_v11 = vsel %vm1903_vm15, %v2304_v46, %v2288_v29 }
 0x94b   :  { %v2292_v30 = vpop.permute.xlu0 %2291 }
 0x94c   :  { %v2294_v20 = vsel %vm1940_vm6, %v2292_v30, 0.0 }
 0x94d   :  { %2295 = vadd.xlane.f32.xlu1 %v2294_v20 }
 0x9d6   :  { %v2296_v2 = vpop.xlane.xlu1 %2295 }
 0x9d7   :  { %v2306_v50 = vsel %vm3855_vm8, %v2305_v11, %v2296_v2 }
 0x9d8   :  { %v2307_v57 = vadd.f32 %v2306_v50, %v1522_v7 }
 0x9da   :  { %2309 = vst.msk [vmem:[#allocation20] sm:$0x3] %vm2308_vm9, %v2307_v57 }
 0x9db   :  { %2806 = shalt.err (!%p2803_p3)
}
 0x9dc   :  { %2319 = dma.vmem_to_hbm [thread:$0]  %s2317_s16, 32, %s3844_s18, [#allocation4]  }
 0x9dd   :  { %2827 = dma.done.wait [#allocation4], 32  }
 0x9de   :  { %2828 = vsyncadd [#allocation4], 4294967264 }
 0x9df   :  { %2323 = vsyncpa [#allocation3], 1 }
 0x9e0   :  { %2324 = vsyncpa [#allocation6], 1 }
 0x9e1   :  { %2325 = vsyncpa [#allocation9], 1 }
 0x9e2   :  { %2326 = vsyncpa [#allocation12], 1 }
 0x9e3   :  { %2327 = vsyncpa [#allocation15], 1 }
 0x9e4   :  { %2328 = vsyncpa [#allocation18], 1 }
 0x9e5   :  { %2329 = vsyncpa [#allocation4], 1 }

</bundles_post_ra>
